<compile_context>
chip_gen: v5e
topology: v5e:2x2
jax: 0.10.0
libtpu: 0.0.40
codegen_flags: <defaults>
</compile_context>

<pallas_src>
import functools

import jax
import jax.numpy as jnp
from jax import lax
from jax.experimental import pallas as pl
from jax.experimental.pallas import tpu as pltpu

F32 = jnp.float32
BF16 = jnp.bfloat16


def _round_up(x, m):
    return ((x + m - 1) // m) * m


def _pad2(w, rows, cols, dtype):
    w = w.astype(F32)
    return jnp.pad(w, ((0, rows - w.shape[0]), (0, cols - w.shape[1]))).astype(dtype)


# ---------------------------------------------------------------------------
# Shared in-kernel multi-layer tanh-RNN recurrence (one batch tile)
# ---------------------------------------------------------------------------
def _rnn_recurrence(x_ref, wih0_ref, b0_ref, wih_r_ref, b_r_ref, whh_ref, act_ref,
                    *, n_layers, seq_len, nb):
    # x_ref:    (L, Nb, Ep) f32  time-major embeddings for this batch tile
    # wih0_ref: (Ep, Hp) bf16    b0_ref: (1, Hp) f32
    # wih_r_ref:(max(n_layers-1,1), Hp, Hp) bf16   b_r_ref: (..., 1, Hp) f32
    # whh_ref:  (n_layers, Hp, Hp) bf16
    # act_ref:  (L*Nb, Hp) f32 VMEM scratch, row = t*Nb + n (time-major)
    ep = x_ref.shape[-1]
    hp = act_ref.shape[-1]

    # hoisted layer-0 input projection: ONE (L*Nb, Ep) @ (Ep, Hp) bf16 MXU matmul
    x2d = x_ref[...].reshape(seq_len * nb, ep).astype(BF16)
    act_ref[...] = (jnp.dot(x2d, wih0_ref[...], preferred_element_type=F32)
                    + b0_ref[...])

    for layer in range(n_layers):
        if layer > 0:
            # hoisted input projection for layer > 0
            # TODO(synk): tile this projection at large L*Nb (in-place full-buffer
            # matmul keeps operand + result live simultaneously).
            act_ref[...] = (jnp.dot(act_ref[...].astype(BF16), wih_r_ref[layer - 1],
                                    preferred_element_type=F32)
                            + b_r_ref[layer - 1])
        whh = whh_ref[layer]                                   # (Hp, Hp) bf16 resident
        h = jnp.zeros((nb, hp), F32)
        # TODO(synk): for long L switch to lax.fori_loop(..., unroll=4..8); L is
        # tiny and static here so a full unroll is fine.
        for t in range(seq_len):
            rows = pl.ds(t * nb, nb)
            h = jnp.tanh(act_ref[rows, :]
                         + jnp.dot(h.astype(BF16), whh, preferred_element_type=F32))
            act_ref[rows, :] = h                               # dense (Nb, Hp) store


# ---------------------------------------------------------------------------
# Fused kernel A: RNN + eos-row attention + pre-fused combined_W/decoder head
# ---------------------------------------------------------------------------
def fused_logits_kernel(eos_ref, x_ref, wih0_ref, b0_ref, wih_r_ref, b_r_ref, whh_ref,
                        w1_ref, w2_ref, bhead_ref, logit_ref, act_ref,
                        *, n_layers, seq_len, nb):
    _rnn_recurrence(x_ref, wih0_ref, b0_ref, wih_r_ref, b_r_ref, whh_ref, act_ref,
                    n_layers=n_layers, seq_len=seq_len, nb=nb)

    b = pl.program_id(0)
    w1 = w1_ref[...]                                           # (Hp, Cp) bf16
    w2 = w2_ref[...]                                           # (Hp, Cp) bf16
    bias = bhead_ref[...]                                      # (1, Cp) f32
    col = lax.broadcasted_iota(jnp.int32, (1, seq_len), 1)

    # TODO(synk): at large Nb switch this per-item loop to a batched masked head.
    rows_out = []
    for n in range(nb):
        e = eos_ref[b * nb + n]                                # int32 scalar (SMEM)
        xn = act_ref[pl.ds(n, seq_len, stride=nb), :]          # (L, Hp) strided vld
        z = act_ref[pl.ds(e * nb + n, 1), :]                   # (1, Hp) dynamic row
        xb = xn.astype(BF16)
        # only the eos row of the attention matrix is needed for the logit
        s = lax.dot_general(z.astype(BF16), xb, (((1,), (1,)), ((), ())),
                            preferred_element_type=F32)        # (1, L)
        s = jnp.where(col < e, s, jnp.float32(-1e9))           # strict lower mask
        m = jnp.max(s, axis=-1, keepdims=True)
        p = jnp.exp(s - m)
        inv = pl.reciprocal(jnp.sum(p, axis=-1, keepdims=True), approx=True)
        att_z = jnp.dot((p * inv).astype(BF16), xb,
                        preferred_element_type=F32)             # (1, Hp)
        rows_out.append(jnp.dot(att_z.astype(BF16), w1, preferred_element_type=F32)
                        + jnp.dot(z.astype(BF16), w2, preferred_element_type=F32)
                        + bias)                                 # (1, Cp)
    logit_ref[...] = jnp.concatenate(rows_out, axis=0)          # one dense (Nb, Cp) store


# ---------------------------------------------------------------------------
# Fused kernel B: RNN + full (L, L) attention-probability output
# ---------------------------------------------------------------------------
def fused_attn_kernel(x_ref, wih0_ref, b0_ref, wih_r_ref, b_r_ref, whh_ref,
                      att_ref, act_ref, *, n_layers, seq_len, nb):
    _rnn_recurrence(x_ref, wih0_ref, b0_ref, wih_r_ref, b_r_ref, whh_ref, act_ref,
                    n_layers=n_layers, seq_len=seq_len, nb=nb)

    r = lax.broadcasted_iota(jnp.int32, (seq_len, seq_len), 0)
    c = lax.broadcasted_iota(jnp.int32, (seq_len, seq_len), 1)
    outs = []
    # TODO(synk): flash-style key tiling for long L (O(L^2) scores/output).
    for n in range(nb):
        xb = act_ref[pl.ds(n, seq_len, stride=nb), :].astype(BF16)   # (L, Hp)
        s = lax.dot_general(xb, xb, (((1,), (1,)), ((), ())),
                            preferred_element_type=F32)              # (L, L)
        s = jnp.where(c < r, s, jnp.float32(-1e9))
        m = jnp.max(s, axis=-1, keepdims=True)
        p = jnp.exp(s - m)
        outs.append(p / jnp.sum(p, axis=-1, keepdims=True))          # exact normalize
    att_ref[...] = jnp.stack(outs, axis=0)                           # (Nb, L, L)


# ---------------------------------------------------------------------------
# Full ATTNLM forward (embedding gather is JAX glue; everything else in-kernel)
# ---------------------------------------------------------------------------
@functools.partial(jax.jit, static_argnames=("return_attn_weights",))
def attnlm_forward(params, x_ids, eos, return_attn_weights=False):
    layers = params['rnn']
    N, L = x_ids.shape
    V, E = params['embedding'].shape
    H = layers[0]['w_hh'].shape[0]
    C = params['w_d'].shape[0]
    n_layers = len(layers)
    n_rec = max(n_layers - 1, 1)

    Ep = _round_up(E, 128)
    Hp = _round_up(H, 128)
    Cp = _round_up(C, 128)
    Nb = min(128, _round_up(N, 8))        # sublane-aligned batch tile (megacore grid)
    Np = _round_up(N, Nb)
    n_tiles = Np // Nb

    # time-major embedding gather, transpose folded into the gather (no extra HBM pass)
    emb_tbl = jnp.pad(params['embedding'].astype(F32), ((0, 0), (0, Ep - E)))
    emb = emb_tbl[jnp.transpose(x_ids)]                        # (L, N, Ep) f32
    emb = jnp.pad(emb, ((0, 0), (0, Np - N), (0, 0)))          # (L, Np, Ep)

    # RNN weights: bf16 MXU operands, zero-padded to lane/sublane tiles
    wih0 = _pad2(jnp.transpose(layers[0]['w_ih']), Ep, Hp, BF16)
    b0 = _pad2((layers[0]['b_ih'] + layers[0]['b_hh']).reshape(1, H), 1, Hp, F32)
    whh = jnp.stack([_pad2(jnp.transpose(l['w_hh']), Hp, Hp, BF16) for l in layers])
    if n_layers > 1:
        wih_r = jnp.stack([_pad2(jnp.transpose(l['w_ih']), Hp, Hp, BF16)
                           for l in layers[1:]])
        b_r = jnp.stack([_pad2((l['b_ih'] + l['b_hh']).reshape(1, H), 1, Hp, F32)
                         for l in layers[1:]])
    else:
        wih_r = jnp.zeros((1, Hp, Hp), BF16)
        b_r = jnp.zeros((1, 1, Hp), F32)

    cparams = pltpu.CompilerParams(dimension_semantics=("parallel",),
                                   vmem_limit_bytes=32 * 1024 * 1024)

    rnn_flops = Np * (2 * L * Ep * Hp + (n_layers - 1) * 2 * L * Hp * Hp
                      + n_layers * 2 * L * Hp * Hp)
    rnn_trans = Np * n_layers * L * Hp
    w_bytes = 2 * (Ep * Hp + (2 * n_layers - 1) * Hp * Hp) + 4 * 2 * n_layers * Hp

    if return_attn_weights:
        att = pl.pallas_call(
            functools.partial(fused_attn_kernel, n_layers=n_layers, seq_len=L, nb=Nb),
            out_shape=jax.ShapeDtypeStruct((Np, L, L), F32),
            grid=(n_tiles,),
            in_specs=[
                pl.BlockSpec((L, Nb, Ep), lambda b: (0, b, 0)),
                pl.BlockSpec((Ep, Hp), lambda b: (0, 0)),
                pl.BlockSpec((1, Hp), lambda b: (0, 0)),
                pl.BlockSpec((n_rec, Hp, Hp), lambda b: (0, 0, 0)),
                pl.BlockSpec((n_rec, 1, Hp), lambda b: (0, 0, 0)),
                pl.BlockSpec((n_layers, Hp, Hp), lambda b: (0, 0, 0)),
            ],
            out_specs=pl.BlockSpec((Nb, L, L), lambda b: (b, 0, 0)),
            scratch_shapes=[pltpu.VMEM((L * Nb, Hp), F32)],
            compiler_params=cparams,
            cost_estimate=pl.CostEstimate(
                flops=rnn_flops + Np * (2 * L * L * Hp + 4 * L * L),
                transcendentals=rnn_trans + Np * L * L,
                bytes_accessed=4 * (L * Np * Ep + Np * L * L) + w_bytes),
        )(emb, wih0, b0, wih_r, b_r, whh)
        return att[:N]

    # head weights: combined_W and decoder pre-multiplied (no nonlinearity between)
    wc_t = jnp.transpose(params['w_c']).astype(F32)            # (2H, H)
    wd_t = jnp.transpose(params['w_d']).astype(F32)            # (H, C)
    w1 = _pad2(wc_t[:H] @ wd_t, Hp, Cp, BF16)                  # att_z branch
    w2 = _pad2(wc_t[H:] @ wd_t, Hp, Cp, BF16)                  # z branch
    bhead = _pad2(params['b_c'].reshape(1, H).astype(F32) @ wd_t
                  + params['b_d'].reshape(1, C).astype(F32), 1, Cp, F32)

    eos_pad = jnp.pad(eos.astype(jnp.int32), (0, Np - N))

    grid_spec = pltpu.PrefetchScalarGridSpec(
        num_scalar_prefetch=1,
        grid=(n_tiles,),
        in_specs=[
            pl.BlockSpec((L, Nb, Ep), lambda b, eos_r: (0, b, 0)),
            pl.BlockSpec((Ep, Hp), lambda b, eos_r: (0, 0)),
            pl.BlockSpec((1, Hp), lambda b, eos_r: (0, 0)),
            pl.BlockSpec((n_rec, Hp, Hp), lambda b, eos_r: (0, 0, 0)),
            pl.BlockSpec((n_rec, 1, Hp), lambda b, eos_r: (0, 0, 0)),
            pl.BlockSpec((n_layers, Hp, Hp), lambda b, eos_r: (0, 0, 0)),
            pl.BlockSpec((Hp, Cp), lambda b, eos_r: (0, 0)),
            pl.BlockSpec((Hp, Cp), lambda b, eos_r: (0, 0)),
            pl.BlockSpec((1, Cp), lambda b, eos_r: (0, 0)),
        ],
        out_specs=pl.BlockSpec((Nb, Cp), lambda b, eos_r: (b, 0)),
        scratch_shapes=[pltpu.VMEM((L * Nb, Hp), F32)],
    )
    logits = pl.pallas_call(
        functools.partial(fused_logits_kernel, n_layers=n_layers, seq_len=L, nb=Nb),
        out_shape=jax.ShapeDtypeStruct((Np, Cp), F32),
        grid_spec=grid_spec,
        compiler_params=cparams,
        cost_estimate=pl.CostEstimate(
            flops=rnn_flops + Np * (6 * L * Hp + 4 * Hp * Cp),
            transcendentals=rnn_trans + Np * L,
            bytes_accessed=4 * (L * Np * Ep + Np * Cp + Cp) + w_bytes + 4 * Hp * Cp),
    )(eos_pad, emb, wih0, b0, wih_r, b_r, whh, w1, w2, bhead)
    return logits[:N, :C]


# ---------------------------------------------------------------------------
# Pure-JAX reference of the PyTorch semantics (correctness check only)
# ---------------------------------------------------------------------------
def attnlm_reference(params, x_ids, eos):
    N, L = x_ids.shape
    emb = params['embedding'][x_ids].astype(F32)
    out_seq = emb
    for layer in params['rnn']:
        H = layer['w_hh'].shape[0]
        h = jnp.zeros((N, H), F32)
        outs = []
        for t in range(L):
            h = jnp.tanh(out_seq[:, t, :] @ layer['w_ih'].T + layer['b_ih']
                         + h @ layer['w_hh'].T + layer['b_hh'])
            outs.append(h)
        out_seq = jnp.stack(outs, axis=1)
    out = out_seq
    eos_oh = jax.nn.one_hot(eos, num_classes=L, dtype=F32)
    z = jnp.einsum('nlh,nl->nh', out, eos_oh)
    scores = jnp.einsum('nth,nsh->nts', out, out)
    row = jnp.arange(L)[:, None]
    col = jnp.arange(L)[None, :]
    scores = jnp.where((col < row)[None], scores, -1e9)
    probs = jax.nn.softmax(scores, axis=-1)
    att_vec = jnp.einsum('nts,nsh->nth', probs, out)
    att_z = jnp.einsum('nlh,nl->nh', att_vec, eos_oh)
    combined = jnp.concatenate([att_z, z], axis=-1) @ params['w_c'].T + params['b_c']
    logits = combined @ params['w_d'].T + params['b_d']
    return logits, probs


# ---------------------------------------------------------------------------
# Deterministic parameter init + demo
# ---------------------------------------------------------------------------
def init_params(key, vocab_size, d_emb, d_hidden, n_layer, num_class):
    keys = jax.random.split(key, 4 + 4 * n_layer)
    s = 1.0 / jnp.sqrt(d_hidden)
    params = {
        'embedding': jax.random.normal(keys[0], (vocab_size, d_emb), F32),
        'rnn': [],
        'w_c': jax.random.uniform(keys[1], (d_hidden, 2 * d_hidden), F32, -s, s),
        'b_c': jax.random.uniform(keys[2], (d_hidden,), F32, -s, s),
    }
    for l in range(n_layer):
        in_dim = d_emb if l == 0 else d_hidden
        k = keys[4 + 4 * l: 4 + 4 * (l + 1)]
        params['rnn'].append({
            'w_ih': jax.random.uniform(k[0], (d_hidden, in_dim), F32, -s, s),
            'w_hh': jax.random.uniform(k[1], (d_hidden, d_hidden), F32, -s, s),
            'b_ih': jax.random.uniform(k[2], (d_hidden,), F32, -s, s),
            'b_hh': jax.random.uniform(k[3], (d_hidden,), F32, -s, s),
        })
    params['w_d'] = jax.random.uniform(keys[3], (num_class, d_hidden), F32, -s, s)
    params['b_d'] = jnp.zeros((num_class,), F32)
    return params


if __name__ == "__main__":
    N, L = 2, 8
    VOCAB, E, H, NLAYER, C = 50, 16, 32, 2, 5

    key = jax.random.PRNGKey(0)
    kp, kx, ke = jax.random.split(key, 3)
    params = init_params(kp, VOCAB, E, H, NLAYER, C)

    x_ids = jax.random.randint(kx, (N, L), 0, VOCAB, dtype=jnp.int32)
    eos = jax.random.randint(ke, (N,), 0, L, dtype=jnp.int32)

    logit = attnlm_forward(params, x_ids, eos)
    att = attnlm_forward(params, x_ids, eos, return_attn_weights=True)
    jax.block_until_ready((logit, att))

    assert logit.shape == (N, C)
    assert att.shape == (N, L, L)

    # correctness check against a pure-JAX reference of the PyTorch semantics.
    # tolerances account for bf16 MXU operands (f32 accumulation), the
    # approximate-reciprocal softmax on the logit path only, and the pre-fused
    # combined_W @ decoder weights.
    ref_logit, ref_att = attnlm_reference(params, x_ids, eos)
    assert jnp.allclose(logit, ref_logit, rtol=3e-2, atol=3e-2), "logit mismatch vs reference"
    assert jnp.allclose(att, ref_att, rtol=3e-2, atol=2e-2), "attention mismatch vs reference"
    # exact normalize on the user-facing attention probs: rows sum to 1
    # (row 0 is the intentional uniform 1/L distribution, as in the reference)
    assert jnp.allclose(jnp.sum(att, axis=-1), 1.0, atol=1e-3)

    print("KERNEL_OK")
</pallas_src>

<mosaic_0001>
module attributes {stable_mosaic.version = 11 : i64} {
  func.func @fused_logits_kernel(%arg0: i32, %arg1: memref<8xi32, #tpu.memory_space<smem>>, %arg2: memref<8x8x128xf32, #tpu.memory_space<vmem>>, %arg3: memref<128x128xbf16, #tpu.memory_space<vmem>>, %arg4: memref<1x128xf32, #tpu.memory_space<vmem>>, %arg5: memref<1x128x128xbf16, #tpu.memory_space<vmem>>, %arg6: memref<1x1x128xf32, #tpu.memory_space<vmem>>, %arg7: memref<2x128x128xbf16, #tpu.memory_space<vmem>>, %arg8: memref<128x128xbf16, #tpu.memory_space<vmem>>, %arg9: memref<128x128xbf16, #tpu.memory_space<vmem>>, %arg10: memref<1x128xf32, #tpu.memory_space<vmem>>, %arg11: memref<8x128xf32, #tpu.memory_space<vmem>>, %arg12: memref<64x128xf32, #tpu.memory_space<vmem>>) attributes {dimension_semantics = [#tpu.dimension_semantics<parallel>], iteration_bounds = array<i64: 1>, scalar_prefetch = 1 : i64, scratch_operands = 1 : i64, tpu.core_type = #tpu.core_type<tc>, window_params = [{transform_indices = @transform_0, window_bounds = array<i64: 8, 8, 128>}, {pipeline_mode = #tpu.pipeline_mode<synchronous>, transform_indices = @transform_1, window_bounds = array<i64: 128, 128>}, {pipeline_mode = #tpu.pipeline_mode<synchronous>, transform_indices = @transform_2, window_bounds = array<i64: 1, 128>}, {pipeline_mode = #tpu.pipeline_mode<synchronous>, transform_indices = @transform_3, window_bounds = array<i64: 1, 128, 128>}, {pipeline_mode = #tpu.pipeline_mode<synchronous>, transform_indices = @transform_4, window_bounds = array<i64: 1, 1, 128>}, {pipeline_mode = #tpu.pipeline_mode<synchronous>, transform_indices = @transform_5, window_bounds = array<i64: 2, 128, 128>}, {pipeline_mode = #tpu.pipeline_mode<synchronous>, transform_indices = @transform_6, window_bounds = array<i64: 128, 128>}, {pipeline_mode = #tpu.pipeline_mode<synchronous>, transform_indices = @transform_7, window_bounds = array<i64: 128, 128>}, {pipeline_mode = #tpu.pipeline_mode<synchronous>, transform_indices = @transform_8, window_bounds = array<i64: 1, 128>}, {transform_indices = @transform_9, window_bounds = array<i64: 8, 128>}]} {
    %c0 = arith.constant 0 : index
    %c0_0 = arith.constant 0 : index
    %c0_1 = arith.constant 0 : index
    %0 = vector.load %arg2[%c0, %c0_0, %c0_1] : memref<8x8x128xf32, #tpu.memory_space<vmem>>, vector<8x8x128xf32>
    %1 = vector.shape_cast %0 : vector<8x8x128xf32> to vector<64x128xf32>
    %2 = arith.truncf %1 : vector<64x128xf32> to vector<64x128xbf16>
    %c0_2 = arith.constant 0 : index
    %c0_3 = arith.constant 0 : index
    %3 = vector.load %arg3[%c0_2, %c0_3] : memref<128x128xbf16, #tpu.memory_space<vmem>>, vector<128x128xbf16>
    %cst = arith.constant dense<0.000000e+00> : vector<64x128xf32>
    %4 = tpu.matmul %2, %3, %cst {dimension_numbers = #tpu.dot_dimension_numbers<[1], [0], [0], [1], [0, 0, 1, 1], [], []>} : vector<64x128xbf16>, vector<128x128xbf16>, vector<64x128xf32> -> vector<64x128xf32>
    %c0_4 = arith.constant 0 : index
    %c0_5 = arith.constant 0 : index
    %5 = vector.load %arg4[%c0_4, %c0_5] : memref<1x128xf32, #tpu.memory_space<vmem>>, vector<1x128xf32>
    %6 = vector.broadcast %5 : vector<1x128xf32> to vector<64x128xf32>
    %7 = arith.addf %4, %6 : vector<64x128xf32>
    %c0_6 = arith.constant 0 : index
    %c0_7 = arith.constant 0 : index
    %8 = vector.load %arg12[%c0_6, %c0_7] : memref<64x128xf32, #tpu.memory_space<vmem>>, vector<64x128xf32>
    tpu.vector_store %arg12[%c0_6, %c0_7], %7 {strides = array<i32>} : memref<64x128xf32, #tpu.memory_space<vmem>>, vector<64x128xf32>,
    %c0_8 = arith.constant 0 : index
    %c0_9 = arith.constant 0 : index
    %c0_10 = arith.constant 0 : index
    %9 = vector.load %arg7[%c0_8, %c0_9, %c0_10] : memref<2x128x128xbf16, #tpu.memory_space<vmem>>, vector<1x128x128xbf16>
    %10 = vector.shape_cast %9 : vector<1x128x128xbf16> to vector<128x128xbf16>
    %cst_11 = arith.constant 0.000000e+00 : f32
    %11 = vector.broadcast %cst_11 : f32 to vector<8x128xf32>
    %c0_12 = arith.constant 0 : index
    %c0_13 = arith.constant 0 : index
    %12 = vector.load %arg12[%c0_12, %c0_13] : memref<64x128xf32, #tpu.memory_space<vmem>>, vector<8x128xf32>
    %13 = arith.truncf %11 : vector<8x128xf32> to vector<8x128xbf16>
    %cst_14 = arith.constant dense<0.000000e+00> : vector<8x128xf32>
    %14 = tpu.matmul %13, %10, %cst_14 {dimension_numbers = #tpu.dot_dimension_numbers<[1], [0], [0], [1], [0, 0, 1, 1], [], []>} : vector<8x128xbf16>, vector<128x128xbf16>, vector<8x128xf32> -> vector<8x128xf32>
    %15 = arith.addf %12, %14 : vector<8x128xf32>
    %16 = math.tanh %15 : vector<8x128xf32>
    %c0_15 = arith.constant 0 : index
    %c0_16 = arith.constant 0 : index
    %17 = vector.load %arg12[%c0_15, %c0_16] : memref<64x128xf32, #tpu.memory_space<vmem>>, vector<8x128xf32>
    tpu.vector_store %arg12[%c0_15, %c0_16], %16 {strides = array<i32>} : memref<64x128xf32, #tpu.memory_space<vmem>>, vector<8x128xf32>,
    %c8 = arith.constant 8 : index
    %c0_17 = arith.constant 0 : index
    %18 = vector.load %arg12[%c8, %c0_17] : memref<64x128xf32, #tpu.memory_space<vmem>>, vector<8x128xf32>
    %19 = arith.truncf %16 : vector<8x128xf32> to vector<8x128xbf16>
    %cst_18 = arith.constant dense<0.000000e+00> : vector<8x128xf32>
    %20 = tpu.matmul %19, %10, %cst_18 {dimension_numbers = #tpu.dot_dimension_numbers<[1], [0], [0], [1], [0, 0, 1, 1], [], []>} : vector<8x128xbf16>, vector<128x128xbf16>, vector<8x128xf32> -> vector<8x128xf32>
    %21 = arith.addf %18, %20 : vector<8x128xf32>
    %22 = math.tanh %21 : vector<8x128xf32>
    %c8_19 = arith.constant 8 : index
    %c0_20 = arith.constant 0 : index
    %23 = vector.load %arg12[%c8_19, %c0_20] : memref<64x128xf32, #tpu.memory_space<vmem>>, vector<8x128xf32>
    tpu.vector_store %arg12[%c8_19, %c0_20], %22 {strides = array<i32>} : memref<64x128xf32, #tpu.memory_space<vmem>>, vector<8x128xf32>,
    %c16 = arith.constant 16 : index
    %c0_21 = arith.constant 0 : index
    %24 = vector.load %arg12[%c16, %c0_21] : memref<64x128xf32, #tpu.memory_space<vmem>>, vector<8x128xf32>
    %25 = arith.truncf %22 : vector<8x128xf32> to vector<8x128xbf16>
    %cst_22 = arith.constant dense<0.000000e+00> : vector<8x128xf32>
    %26 = tpu.matmul %25, %10, %cst_22 {dimension_numbers = #tpu.dot_dimension_numbers<[1], [0], [0], [1], [0, 0, 1, 1], [], []>} : vector<8x128xbf16>, vector<128x128xbf16>, vector<8x128xf32> -> vector<8x128xf32>
    %27 = arith.addf %24, %26 : vector<8x128xf32>
    %28 = math.tanh %27 : vector<8x128xf32>
    %c16_23 = arith.constant 16 : index
    %c0_24 = arith.constant 0 : index
    %29 = vector.load %arg12[%c16_23, %c0_24] : memref<64x128xf32, #tpu.memory_space<vmem>>, vector<8x128xf32>
    tpu.vector_store %arg12[%c16_23, %c0_24], %28 {strides = array<i32>} : memref<64x128xf32, #tpu.memory_space<vmem>>, vector<8x128xf32>,
    %c24 = arith.constant 24 : index
    %c0_25 = arith.constant 0 : index
    %30 = vector.load %arg12[%c24, %c0_25] : memref<64x128xf32, #tpu.memory_space<vmem>>, vector<8x128xf32>
    %31 = arith.truncf %28 : vector<8x128xf32> to vector<8x128xbf16>
    %cst_26 = arith.constant dense<0.000000e+00> : vector<8x128xf32>
    %32 = tpu.matmul %31, %10, %cst_26 {dimension_numbers = #tpu.dot_dimension_numbers<[1], [0], [0], [1], [0, 0, 1, 1], [], []>} : vector<8x128xbf16>, vector<128x128xbf16>, vector<8x128xf32> -> vector<8x128xf32>
    %33 = arith.addf %30, %32 : vector<8x128xf32>
    %34 = math.tanh %33 : vector<8x128xf32>
    %c24_27 = arith.constant 24 : index
    %c0_28 = arith.constant 0 : index
    %35 = vector.load %arg12[%c24_27, %c0_28] : memref<64x128xf32, #tpu.memory_space<vmem>>, vector<8x128xf32>
    tpu.vector_store %arg12[%c24_27, %c0_28], %34 {strides = array<i32>} : memref<64x128xf32, #tpu.memory_space<vmem>>, vector<8x128xf32>,
    %c32 = arith.constant 32 : index
    %c0_29 = arith.constant 0 : index
    %36 = vector.load %arg12[%c32, %c0_29] : memref<64x128xf32, #tpu.memory_space<vmem>>, vector<8x128xf32>
    %37 = arith.truncf %34 : vector<8x128xf32> to vector<8x128xbf16>
    %cst_30 = arith.constant dense<0.000000e+00> : vector<8x128xf32>
    %38 = tpu.matmul %37, %10, %cst_30 {dimension_numbers = #tpu.dot_dimension_numbers<[1], [0], [0], [1], [0, 0, 1, 1], [], []>} : vector<8x128xbf16>, vector<128x128xbf16>, vector<8x128xf32> -> vector<8x128xf32>
    %39 = arith.addf %36, %38 : vector<8x128xf32>
    %40 = math.tanh %39 : vector<8x128xf32>
    %c32_31 = arith.constant 32 : index
    %c0_32 = arith.constant 0 : index
    %41 = vector.load %arg12[%c32_31, %c0_32] : memref<64x128xf32, #tpu.memory_space<vmem>>, vector<8x128xf32>
    tpu.vector_store %arg12[%c32_31, %c0_32], %40 {strides = array<i32>} : memref<64x128xf32, #tpu.memory_space<vmem>>, vector<8x128xf32>,
    %c40 = arith.constant 40 : index
    %c0_33 = arith.constant 0 : index
    %42 = vector.load %arg12[%c40, %c0_33] : memref<64x128xf32, #tpu.memory_space<vmem>>, vector<8x128xf32>
    %43 = arith.truncf %40 : vector<8x128xf32> to vector<8x128xbf16>
    %cst_34 = arith.constant dense<0.000000e+00> : vector<8x128xf32>
    %44 = tpu.matmul %43, %10, %cst_34 {dimension_numbers = #tpu.dot_dimension_numbers<[1], [0], [0], [1], [0, 0, 1, 1], [], []>} : vector<8x128xbf16>, vector<128x128xbf16>, vector<8x128xf32> -> vector<8x128xf32>
    %45 = arith.addf %42, %44 : vector<8x128xf32>
    %46 = math.tanh %45 : vector<8x128xf32>
    %c40_35 = arith.constant 40 : index
    %c0_36 = arith.constant 0 : index
    %47 = vector.load %arg12[%c40_35, %c0_36] : memref<64x128xf32, #tpu.memory_space<vmem>>, vector<8x128xf32>
    tpu.vector_store %arg12[%c40_35, %c0_36], %46 {strides = array<i32>} : memref<64x128xf32, #tpu.memory_space<vmem>>, vector<8x128xf32>,
    %c48 = arith.constant 48 : index
    %c0_37 = arith.constant 0 : index
    %48 = vector.load %arg12[%c48, %c0_37] : memref<64x128xf32, #tpu.memory_space<vmem>>, vector<8x128xf32>
    %49 = arith.truncf %46 : vector<8x128xf32> to vector<8x128xbf16>
    %cst_38 = arith.constant dense<0.000000e+00> : vector<8x128xf32>
    %50 = tpu.matmul %49, %10, %cst_38 {dimension_numbers = #tpu.dot_dimension_numbers<[1], [0], [0], [1], [0, 0, 1, 1], [], []>} : vector<8x128xbf16>, vector<128x128xbf16>, vector<8x128xf32> -> vector<8x128xf32>
    %51 = arith.addf %48, %50 : vector<8x128xf32>
    %52 = math.tanh %51 : vector<8x128xf32>
    %c48_39 = arith.constant 48 : index
    %c0_40 = arith.constant 0 : index
    %53 = vector.load %arg12[%c48_39, %c0_40] : memref<64x128xf32, #tpu.memory_space<vmem>>, vector<8x128xf32>
    tpu.vector_store %arg12[%c48_39, %c0_40], %52 {strides = array<i32>} : memref<64x128xf32, #tpu.memory_space<vmem>>, vector<8x128xf32>,
    %c56 = arith.constant 56 : index
    %c0_41 = arith.constant 0 : index
    %54 = vector.load %arg12[%c56, %c0_41] : memref<64x128xf32, #tpu.memory_space<vmem>>, vector<8x128xf32>
    %55 = arith.truncf %52 : vector<8x128xf32> to vector<8x128xbf16>
    %cst_42 = arith.constant dense<0.000000e+00> : vector<8x128xf32>
    %56 = tpu.matmul %55, %10, %cst_42 {dimension_numbers = #tpu.dot_dimension_numbers<[1], [0], [0], [1], [0, 0, 1, 1], [], []>} : vector<8x128xbf16>, vector<128x128xbf16>, vector<8x128xf32> -> vector<8x128xf32>
    %57 = arith.addf %54, %56 : vector<8x128xf32>
    %58 = math.tanh %57 : vector<8x128xf32>
    %c56_43 = arith.constant 56 : index
    %c0_44 = arith.constant 0 : index
    %59 = vector.load %arg12[%c56_43, %c0_44] : memref<64x128xf32, #tpu.memory_space<vmem>>, vector<8x128xf32>
    tpu.vector_store %arg12[%c56_43, %c0_44], %58 {strides = array<i32>} : memref<64x128xf32, #tpu.memory_space<vmem>>, vector<8x128xf32>,
    %c0_45 = arith.constant 0 : index
    %c0_46 = arith.constant 0 : index
    %60 = vector.load %arg12[%c0_45, %c0_46] : memref<64x128xf32, #tpu.memory_space<vmem>>, vector<64x128xf32>
    %61 = arith.truncf %60 : vector<64x128xf32> to vector<64x128xbf16>
    %c0_47 = arith.constant 0 : index
    %c0_48 = arith.constant 0 : index
    %c0_49 = arith.constant 0 : index
    %62 = vector.load %arg5[%c0_47, %c0_48, %c0_49] : memref<1x128x128xbf16, #tpu.memory_space<vmem>>, vector<1x128x128xbf16>
    %63 = vector.shape_cast %62 : vector<1x128x128xbf16> to vector<128x128xbf16>
    %cst_50 = arith.constant dense<0.000000e+00> : vector<64x128xf32>
    %64 = tpu.matmul %61, %63, %cst_50 {dimension_numbers = #tpu.dot_dimension_numbers<[1], [0], [0], [1], [0, 0, 1, 1], [], []>} : vector<64x128xbf16>, vector<128x128xbf16>, vector<64x128xf32> -> vector<64x128xf32>
    %c0_51 = arith.constant 0 : index
    %c0_52 = arith.constant 0 : index
    %c0_53 = arith.constant 0 : index
    %65 = vector.load %arg6[%c0_51, %c0_52, %c0_53] : memref<1x1x128xf32, #tpu.memory_space<vmem>>, vector<1x1x128xf32>
    %66 = vector.shape_cast %65 : vector<1x1x128xf32> to vector<1x128xf32>
    %67 = vector.broadcast %66 : vector<1x128xf32> to vector<64x128xf32>
    %68 = arith.addf %64, %67 : vector<64x128xf32>
    %c0_54 = arith.constant 0 : index
    %c0_55 = arith.constant 0 : index
    %69 = vector.load %arg12[%c0_54, %c0_55] : memref<64x128xf32, #tpu.memory_space<vmem>>, vector<64x128xf32>
    tpu.vector_store %arg12[%c0_54, %c0_55], %68 {strides = array<i32>} : memref<64x128xf32, #tpu.memory_space<vmem>>, vector<64x128xf32>,
    %c1 = arith.constant 1 : index
    %c0_56 = arith.constant 0 : index
    %c0_57 = arith.constant 0 : index
    %70 = vector.load %arg7[%c1, %c0_56, %c0_57] : memref<2x128x128xbf16, #tpu.memory_space<vmem>>, vector<1x128x128xbf16>
    %71 = vector.shape_cast %70 : vector<1x128x128xbf16> to vector<128x128xbf16>
    %cst_58 = arith.constant 0.000000e+00 : f32
    %72 = vector.broadcast %cst_58 : f32 to vector<8x128xf32>
    %c0_59 = arith.constant 0 : index
    %c0_60 = arith.constant 0 : index
    %73 = vector.load %arg12[%c0_59, %c0_60] : memref<64x128xf32, #tpu.memory_space<vmem>>, vector<8x128xf32>
    %74 = arith.truncf %72 : vector<8x128xf32> to vector<8x128xbf16>
    %cst_61 = arith.constant dense<0.000000e+00> : vector<8x128xf32>
    %75 = tpu.matmul %74, %71, %cst_61 {dimension_numbers = #tpu.dot_dimension_numbers<[1], [0], [0], [1], [0, 0, 1, 1], [], []>} : vector<8x128xbf16>, vector<128x128xbf16>, vector<8x128xf32> -> vector<8x128xf32>
    %76 = arith.addf %73, %75 : vector<8x128xf32>
    %77 = math.tanh %76 : vector<8x128xf32>
    %c0_62 = arith.constant 0 : index
    %c0_63 = arith.constant 0 : index
    %78 = vector.load %arg12[%c0_62, %c0_63] : memref<64x128xf32, #tpu.memory_space<vmem>>, vector<8x128xf32>
    tpu.vector_store %arg12[%c0_62, %c0_63], %77 {strides = array<i32>} : memref<64x128xf32, #tpu.memory_space<vmem>>, vector<8x128xf32>,
    %c8_64 = arith.constant 8 : index
    %c0_65 = arith.constant 0 : index
    %79 = vector.load %arg12[%c8_64, %c0_65] : memref<64x128xf32, #tpu.memory_space<vmem>>, vector<8x128xf32>
    %80 = arith.truncf %77 : vector<8x128xf32> to vector<8x128xbf16>
    %cst_66 = arith.constant dense<0.000000e+00> : vector<8x128xf32>
    %81 = tpu.matmul %80, %71, %cst_66 {dimension_numbers = #tpu.dot_dimension_numbers<[1], [0], [0], [1], [0, 0, 1, 1], [], []>} : vector<8x128xbf16>, vector<128x128xbf16>, vector<8x128xf32> -> vector<8x128xf32>
    %82 = arith.addf %79, %81 : vector<8x128xf32>
    %83 = math.tanh %82 : vector<8x128xf32>
    %c8_67 = arith.constant 8 : index
    %c0_68 = arith.constant 0 : index
    %84 = vector.load %arg12[%c8_67, %c0_68] : memref<64x128xf32, #tpu.memory_space<vmem>>, vector<8x128xf32>
    tpu.vector_store %arg12[%c8_67, %c0_68], %83 {strides = array<i32>} : memref<64x128xf32, #tpu.memory_space<vmem>>, vector<8x128xf32>,
    %c16_69 = arith.constant 16 : index
    %c0_70 = arith.constant 0 : index
    %85 = vector.load %arg12[%c16_69, %c0_70] : memref<64x128xf32, #tpu.memory_space<vmem>>, vector<8x128xf32>
    %86 = arith.truncf %83 : vector<8x128xf32> to vector<8x128xbf16>
    %cst_71 = arith.constant dense<0.000000e+00> : vector<8x128xf32>
    %87 = tpu.matmul %86, %71, %cst_71 {dimension_numbers = #tpu.dot_dimension_numbers<[1], [0], [0], [1], [0, 0, 1, 1], [], []>} : vector<8x128xbf16>, vector<128x128xbf16>, vector<8x128xf32> -> vector<8x128xf32>
    %88 = arith.addf %85, %87 : vector<8x128xf32>
    %89 = math.tanh %88 : vector<8x128xf32>
    %c16_72 = arith.constant 16 : index
    %c0_73 = arith.constant 0 : index
    %90 = vector.load %arg12[%c16_72, %c0_73] : memref<64x128xf32, #tpu.memory_space<vmem>>, vector<8x128xf32>
    tpu.vector_store %arg12[%c16_72, %c0_73], %89 {strides = array<i32>} : memref<64x128xf32, #tpu.memory_space<vmem>>, vector<8x128xf32>,
    %c24_74 = arith.constant 24 : index
    %c0_75 = arith.constant 0 : index
    %91 = vector.load %arg12[%c24_74, %c0_75] : memref<64x128xf32, #tpu.memory_space<vmem>>, vector<8x128xf32>
    %92 = arith.truncf %89 : vector<8x128xf32> to vector<8x128xbf16>
    %cst_76 = arith.constant dense<0.000000e+00> : vector<8x128xf32>
    %93 = tpu.matmul %92, %71, %cst_76 {dimension_numbers = #tpu.dot_dimension_numbers<[1], [0], [0], [1], [0, 0, 1, 1], [], []>} : vector<8x128xbf16>, vector<128x128xbf16>, vector<8x128xf32> -> vector<8x128xf32>
    %94 = arith.addf %91, %93 : vector<8x128xf32>
    %95 = math.tanh %94 : vector<8x128xf32>
    %c24_77 = arith.constant 24 : index
    %c0_78 = arith.constant 0 : index
    %96 = vector.load %arg12[%c24_77, %c0_78] : memref<64x128xf32, #tpu.memory_space<vmem>>, vector<8x128xf32>
    tpu.vector_store %arg12[%c24_77, %c0_78], %95 {strides = array<i32>} : memref<64x128xf32, #tpu.memory_space<vmem>>, vector<8x128xf32>,
    %c32_79 = arith.constant 32 : index
    %c0_80 = arith.constant 0 : index
    %97 = vector.load %arg12[%c32_79, %c0_80] : memref<64x128xf32, #tpu.memory_space<vmem>>, vector<8x128xf32>
    %98 = arith.truncf %95 : vector<8x128xf32> to vector<8x128xbf16>
    %cst_81 = arith.constant dense<0.000000e+00> : vector<8x128xf32>
    %99 = tpu.matmul %98, %71, %cst_81 {dimension_numbers = #tpu.dot_dimension_numbers<[1], [0], [0], [1], [0, 0, 1, 1], [], []>} : vector<8x128xbf16>, vector<128x128xbf16>, vector<8x128xf32> -> vector<8x128xf32>
    %100 = arith.addf %97, %99 : vector<8x128xf32>
    %101 = math.tanh %100 : vector<8x128xf32>
    %c32_82 = arith.constant 32 : index
    %c0_83 = arith.constant 0 : index
    %102 = vector.load %arg12[%c32_82, %c0_83] : memref<64x128xf32, #tpu.memory_space<vmem>>, vector<8x128xf32>
    tpu.vector_store %arg12[%c32_82, %c0_83], %101 {strides = array<i32>} : memref<64x128xf32, #tpu.memory_space<vmem>>, vector<8x128xf32>,
    %c40_84 = arith.constant 40 : index
    %c0_85 = arith.constant 0 : index
    %103 = vector.load %arg12[%c40_84, %c0_85] : memref<64x128xf32, #tpu.memory_space<vmem>>, vector<8x128xf32>
    %104 = arith.truncf %101 : vector<8x128xf32> to vector<8x128xbf16>
    %cst_86 = arith.constant dense<0.000000e+00> : vector<8x128xf32>
    %105 = tpu.matmul %104, %71, %cst_86 {dimension_numbers = #tpu.dot_dimension_numbers<[1], [0], [0], [1], [0, 0, 1, 1], [], []>} : vector<8x128xbf16>, vector<128x128xbf16>, vector<8x128xf32> -> vector<8x128xf32>
    %106 = arith.addf %103, %105 : vector<8x128xf32>
    %107 = math.tanh %106 : vector<8x128xf32>
    %c40_87 = arith.constant 40 : index
    %c0_88 = arith.constant 0 : index
    %108 = vector.load %arg12[%c40_87, %c0_88] : memref<64x128xf32, #tpu.memory_space<vmem>>, vector<8x128xf32>
    tpu.vector_store %arg12[%c40_87, %c0_88], %107 {strides = array<i32>} : memref<64x128xf32, #tpu.memory_space<vmem>>, vector<8x128xf32>,
    %c48_89 = arith.constant 48 : index
    %c0_90 = arith.constant 0 : index
    %109 = vector.load %arg12[%c48_89, %c0_90] : memref<64x128xf32, #tpu.memory_space<vmem>>, vector<8x128xf32>
    %110 = arith.truncf %107 : vector<8x128xf32> to vector<8x128xbf16>
    %cst_91 = arith.constant dense<0.000000e+00> : vector<8x128xf32>
    %111 = tpu.matmul %110, %71, %cst_91 {dimension_numbers = #tpu.dot_dimension_numbers<[1], [0], [0], [1], [0, 0, 1, 1], [], []>} : vector<8x128xbf16>, vector<128x128xbf16>, vector<8x128xf32> -> vector<8x128xf32>
    %112 = arith.addf %109, %111 : vector<8x128xf32>
    %113 = math.tanh %112 : vector<8x128xf32>
    %c48_92 = arith.constant 48 : index
    %c0_93 = arith.constant 0 : index
    %114 = vector.load %arg12[%c48_92, %c0_93] : memref<64x128xf32, #tpu.memory_space<vmem>>, vector<8x128xf32>
    tpu.vector_store %arg12[%c48_92, %c0_93], %113 {strides = array<i32>} : memref<64x128xf32, #tpu.memory_space<vmem>>, vector<8x128xf32>,
    %c56_94 = arith.constant 56 : index
    %c0_95 = arith.constant 0 : index
    %115 = vector.load %arg12[%c56_94, %c0_95] : memref<64x128xf32, #tpu.memory_space<vmem>>, vector<8x128xf32>
    %116 = arith.truncf %113 : vector<8x128xf32> to vector<8x128xbf16>
    %cst_96 = arith.constant dense<0.000000e+00> : vector<8x128xf32>
    %117 = tpu.matmul %116, %71, %cst_96 {dimension_numbers = #tpu.dot_dimension_numbers<[1], [0], [0], [1], [0, 0, 1, 1], [], []>} : vector<8x128xbf16>, vector<128x128xbf16>, vector<8x128xf32> -> vector<8x128xf32>
    %118 = arith.addf %115, %117 : vector<8x128xf32>
    %119 = math.tanh %118 : vector<8x128xf32>
    %c56_97 = arith.constant 56 : index
    %c0_98 = arith.constant 0 : index
    %120 = vector.load %arg12[%c56_97, %c0_98] : memref<64x128xf32, #tpu.memory_space<vmem>>, vector<8x128xf32>
    tpu.vector_store %arg12[%c56_97, %c0_98], %119 {strides = array<i32>} : memref<64x128xf32, #tpu.memory_space<vmem>>, vector<8x128xf32>,
    %c0_99 = arith.constant 0 : index
    %c0_100 = arith.constant 0 : index
    %121 = vector.load %arg8[%c0_99, %c0_100] : memref<128x128xbf16, #tpu.memory_space<vmem>>, vector<128x128xbf16>
    %c0_101 = arith.constant 0 : index
    %c0_102 = arith.constant 0 : index
    %122 = vector.load %arg9[%c0_101, %c0_102] : memref<128x128xbf16, #tpu.memory_space<vmem>>, vector<128x128xbf16>
    %c0_103 = arith.constant 0 : index
    %c0_104 = arith.constant 0 : index
    %123 = vector.load %arg10[%c0_103, %c0_104] : memref<1x128xf32, #tpu.memory_space<vmem>>, vector<1x128xf32>
    %124 = tpu.iota {dimensions = array<i32: 1>} : vector<1x8xi32>
    %c8_i32 = arith.constant 8 : i32
    %125 = arith.muli %arg0, %c8_i32 : i32
    %c0_i32 = arith.constant 0 : i32
    %126 = arith.addi %125, %c0_i32 : i32
    %127 = arith.index_cast %126 : i32 to index
    %128 = memref.load %arg1[%127] : memref<8xi32, #tpu.memory_space<smem>>
    %c0_105 = arith.constant 0 : index
    %c0_106 = arith.constant 0 : index
    %129 = tpu.strided_load %arg12[%c0_105, %c0_106] {strides = array<i32: 8, 1>} : memref<64x128xf32, #tpu.memory_space<vmem>>, vector<8x128xf32>
    %c8_i32_107 = arith.constant 8 : i32
    %130 = arith.muli %128, %c8_i32_107 : i32
    %c0_i32_108 = arith.constant 0 : i32
    %131 = arith.addi %130, %c0_i32_108 : i32
    %132 = arith.index_cast %131 : i32 to index
    %c0_109 = arith.constant 0 : index
    %133 = vector.load %arg12[%132, %c0_109] : memref<64x128xf32, #tpu.memory_space<vmem>>, vector<1x128xf32>
    %134 = arith.truncf %129 : vector<8x128xf32> to vector<8x128xbf16>
    %135 = arith.truncf %133 : vector<1x128xf32> to vector<1x128xbf16>
    %cst_110 = arith.constant dense<0.000000e+00> : vector<1x8xf32>
    %136 = tpu.matmul %135, %134, %cst_110 {dimension_numbers = #tpu.dot_dimension_numbers<[1], [1], [0], [0], [0, 0, 1, 0], [], []>} : vector<1x128xbf16>, vector<8x128xbf16>, vector<1x8xf32> -> vector<1x8xf32>
    %137 = vector.broadcast %128 : i32 to vector<1x8xi32>
    %138 = arith.cmpi slt, %124, %137 : vector<1x8xi32>
    %cst_111 = arith.constant -1.000000e+09 : f32
    %139 = vector.broadcast %cst_111 : f32 to vector<1x8xf32>
    %140 = arith.select %138, %136, %139 : vector<1x8xi1>, vector<1x8xf32>
    %cst_112 = arith.constant dense<0xFF800000> : vector<1xf32>
    %141 = vector.multi_reduction <maximumf>, %140, %cst_112 [1] : vector<1x8xf32> to vector<1xf32>
    %142 = vector.shape_cast %141 : vector<1xf32> to vector<1x1xf32>
    %143 = vector.broadcast %142 : vector<1x1xf32> to vector<1x8xf32>
    %144 = arith.subf %140, %143 : vector<1x8xf32>
    %145 = math.exp %144 : vector<1x8xf32>
    %cst_113 = arith.constant dense<0.000000e+00> : vector<1xf32>
    %146 = vector.multi_reduction <add>, %145, %cst_113 [1] : vector<1x8xf32> to vector<1xf32>
    %147 = vector.shape_cast %146 : vector<1xf32> to vector<1x1xf32>
    %148 = tpu.reciprocal %147 {approx = true} : vector<1x1xf32> -> vector<1x1xf32>
    %149 = vector.broadcast %148 : vector<1x1xf32> to vector<1x8xf32>
    %150 = arith.mulf %145, %149 : vector<1x8xf32>
    %151 = arith.truncf %150 : vector<1x8xf32> to vector<1x8xbf16>
    %cst_114 = arith.constant dense<0.000000e+00> : vector<1x128xf32>
    %152 = tpu.matmul %151, %134, %cst_114 {dimension_numbers = #tpu.dot_dimension_numbers<[1], [0], [0], [1], [0, 0, 1, 1], [], []>} : vector<1x8xbf16>, vector<8x128xbf16>, vector<1x128xf32> -> vector<1x128xf32>
    %153 = arith.truncf %152 : vector<1x128xf32> to vector<1x128xbf16>
    %cst_115 = arith.constant dense<0.000000e+00> : vector<1x128xf32>
    %154 = tpu.matmul %153, %121, %cst_115 {dimension_numbers = #tpu.dot_dimension_numbers<[1], [0], [0], [1], [0, 0, 1, 1], [], []>} : vector<1x128xbf16>, vector<128x128xbf16>, vector<1x128xf32> -> vector<1x128xf32>
    %155 = arith.truncf %133 : vector<1x128xf32> to vector<1x128xbf16>
    %cst_116 = arith.constant dense<0.000000e+00> : vector<1x128xf32>
    %156 = tpu.matmul %155, %122, %cst_116 {dimension_numbers = #tpu.dot_dimension_numbers<[1], [0], [0], [1], [0, 0, 1, 1], [], []>} : vector<1x128xbf16>, vector<128x128xbf16>, vector<1x128xf32> -> vector<1x128xf32>
    %157 = arith.addf %154, %156 : vector<1x128xf32>
    %158 = arith.addf %157, %123 : vector<1x128xf32>
    %c8_i32_117 = arith.constant 8 : i32
    %159 = arith.muli %arg0, %c8_i32_117 : i32
    %c1_i32 = arith.constant 1 : i32
    %160 = arith.addi %159, %c1_i32 : i32
    %161 = arith.index_cast %160 : i32 to index
    %162 = memref.load %arg1[%161] : memref<8xi32, #tpu.memory_space<smem>>
    %c1_118 = arith.constant 1 : index
    %c0_119 = arith.constant 0 : index
    %163 = tpu.strided_load %arg12[%c1_118, %c0_119] {strides = array<i32: 8, 1>} : memref<64x128xf32, #tpu.memory_space<vmem>>, vector<8x128xf32>
    %c8_i32_120 = arith.constant 8 : i32
    %164 = arith.muli %162, %c8_i32_120 : i32
    %c1_i32_121 = arith.constant 1 : i32
    %165 = arith.addi %164, %c1_i32_121 : i32
    %166 = arith.index_cast %165 : i32 to index
    %c0_122 = arith.constant 0 : index
    %167 = vector.load %arg12[%166, %c0_122] : memref<64x128xf32, #tpu.memory_space<vmem>>, vector<1x128xf32>
    %168 = arith.truncf %163 : vector<8x128xf32> to vector<8x128xbf16>
    %169 = arith.truncf %167 : vector<1x128xf32> to vector<1x128xbf16>
    %cst_123 = arith.constant dense<0.000000e+00> : vector<1x8xf32>
    %170 = tpu.matmul %169, %168, %cst_123 {dimension_numbers = #tpu.dot_dimension_numbers<[1], [1], [0], [0], [0, 0, 1, 0], [], []>} : vector<1x128xbf16>, vector<8x128xbf16>, vector<1x8xf32> -> vector<1x8xf32>
    %171 = vector.broadcast %162 : i32 to vector<1x8xi32>
    %172 = arith.cmpi slt, %124, %171 : vector<1x8xi32>
    %cst_124 = arith.constant -1.000000e+09 : f32
    %173 = vector.broadcast %cst_124 : f32 to vector<1x8xf32>
    %174 = arith.select %172, %170, %173 : vector<1x8xi1>, vector<1x8xf32>
    %cst_125 = arith.constant dense<0xFF800000> : vector<1xf32>
    %175 = vector.multi_reduction <maximumf>, %174, %cst_125 [1] : vector<1x8xf32> to vector<1xf32>
    %176 = vector.shape_cast %175 : vector<1xf32> to vector<1x1xf32>
    %177 = vector.broadcast %176 : vector<1x1xf32> to vector<1x8xf32>
    %178 = arith.subf %174, %177 : vector<1x8xf32>
    %179 = math.exp %178 : vector<1x8xf32>
    %cst_126 = arith.constant dense<0.000000e+00> : vector<1xf32>
    %180 = vector.multi_reduction <add>, %179, %cst_126 [1] : vector<1x8xf32> to vector<1xf32>
    %181 = vector.shape_cast %180 : vector<1xf32> to vector<1x1xf32>
    %182 = tpu.reciprocal %181 {approx = true} : vector<1x1xf32> -> vector<1x1xf32>
    %183 = vector.broadcast %182 : vector<1x1xf32> to vector<1x8xf32>
    %184 = arith.mulf %179, %183 : vector<1x8xf32>
    %185 = arith.truncf %184 : vector<1x8xf32> to vector<1x8xbf16>
    %cst_127 = arith.constant dense<0.000000e+00> : vector<1x128xf32>
    %186 = tpu.matmul %185, %168, %cst_127 {dimension_numbers = #tpu.dot_dimension_numbers<[1], [0], [0], [1], [0, 0, 1, 1], [], []>} : vector<1x8xbf16>, vector<8x128xbf16>, vector<1x128xf32> -> vector<1x128xf32>
    %187 = arith.truncf %186 : vector<1x128xf32> to vector<1x128xbf16>
    %cst_128 = arith.constant dense<0.000000e+00> : vector<1x128xf32>
    %188 = tpu.matmul %187, %121, %cst_128 {dimension_numbers = #tpu.dot_dimension_numbers<[1], [0], [0], [1], [0, 0, 1, 1], [], []>} : vector<1x128xbf16>, vector<128x128xbf16>, vector<1x128xf32> -> vector<1x128xf32>
    %189 = arith.truncf %167 : vector<1x128xf32> to vector<1x128xbf16>
    %cst_129 = arith.constant dense<0.000000e+00> : vector<1x128xf32>
    %190 = tpu.matmul %189, %122, %cst_129 {dimension_numbers = #tpu.dot_dimension_numbers<[1], [0], [0], [1], [0, 0, 1, 1], [], []>} : vector<1x128xbf16>, vector<128x128xbf16>, vector<1x128xf32> -> vector<1x128xf32>
    %191 = arith.addf %188, %190 : vector<1x128xf32>
    %192 = arith.addf %191, %123 : vector<1x128xf32>
    %c8_i32_130 = arith.constant 8 : i32
    %193 = arith.muli %arg0, %c8_i32_130 : i32
    %c2_i32 = arith.constant 2 : i32
    %194 = arith.addi %193, %c2_i32 : i32
    %195 = arith.index_cast %194 : i32 to index
    %196 = memref.load %arg1[%195] : memref<8xi32, #tpu.memory_space<smem>>
    %c2 = arith.constant 2 : index
    %c0_131 = arith.constant 0 : index
    %197 = tpu.strided_load %arg12[%c2, %c0_131] {strides = array<i32: 8, 1>} : memref<64x128xf32, #tpu.memory_space<vmem>>, vector<8x128xf32>
    %c8_i32_132 = arith.constant 8 : i32
    %198 = arith.muli %196, %c8_i32_132 : i32
    %c2_i32_133 = arith.constant 2 : i32
    %199 = arith.addi %198, %c2_i32_133 : i32
    %200 = arith.index_cast %199 : i32 to index
    %c0_134 = arith.constant 0 : index
    %201 = vector.load %arg12[%200, %c0_134] : memref<64x128xf32, #tpu.memory_space<vmem>>, vector<1x128xf32>
    %202 = arith.truncf %197 : vector<8x128xf32> to vector<8x128xbf16>
    %203 = arith.truncf %201 : vector<1x128xf32> to vector<1x128xbf16>
    %cst_135 = arith.constant dense<0.000000e+00> : vector<1x8xf32>
    %204 = tpu.matmul %203, %202, %cst_135 {dimension_numbers = #tpu.dot_dimension_numbers<[1], [1], [0], [0], [0, 0, 1, 0], [], []>} : vector<1x128xbf16>, vector<8x128xbf16>, vector<1x8xf32> -> vector<1x8xf32>
    %205 = vector.broadcast %196 : i32 to vector<1x8xi32>
    %206 = arith.cmpi slt, %124, %205 : vector<1x8xi32>
    %cst_136 = arith.constant -1.000000e+09 : f32
    %207 = vector.broadcast %cst_136 : f32 to vector<1x8xf32>
    %208 = arith.select %206, %204, %207 : vector<1x8xi1>, vector<1x8xf32>
    %cst_137 = arith.constant dense<0xFF800000> : vector<1xf32>
    %209 = vector.multi_reduction <maximumf>, %208, %cst_137 [1] : vector<1x8xf32> to vector<1xf32>
    %210 = vector.shape_cast %209 : vector<1xf32> to vector<1x1xf32>
    %211 = vector.broadcast %210 : vector<1x1xf32> to vector<1x8xf32>
    %212 = arith.subf %208, %211 : vector<1x8xf32>
    %213 = math.exp %212 : vector<1x8xf32>
    %cst_138 = arith.constant dense<0.000000e+00> : vector<1xf32>
    %214 = vector.multi_reduction <add>, %213, %cst_138 [1] : vector<1x8xf32> to vector<1xf32>
    %215 = vector.shape_cast %214 : vector<1xf32> to vector<1x1xf32>
    %216 = tpu.reciprocal %215 {approx = true} : vector<1x1xf32> -> vector<1x1xf32>
    %217 = vector.broadcast %216 : vector<1x1xf32> to vector<1x8xf32>
    %218 = arith.mulf %213, %217 : vector<1x8xf32>
    %219 = arith.truncf %218 : vector<1x8xf32> to vector<1x8xbf16>
    %cst_139 = arith.constant dense<0.000000e+00> : vector<1x128xf32>
    %220 = tpu.matmul %219, %202, %cst_139 {dimension_numbers = #tpu.dot_dimension_numbers<[1], [0], [0], [1], [0, 0, 1, 1], [], []>} : vector<1x8xbf16>, vector<8x128xbf16>, vector<1x128xf32> -> vector<1x128xf32>
    %221 = arith.truncf %220 : vector<1x128xf32> to vector<1x128xbf16>
    %cst_140 = arith.constant dense<0.000000e+00> : vector<1x128xf32>
    %222 = tpu.matmul %221, %121, %cst_140 {dimension_numbers = #tpu.dot_dimension_numbers<[1], [0], [0], [1], [0, 0, 1, 1], [], []>} : vector<1x128xbf16>, vector<128x128xbf16>, vector<1x128xf32> -> vector<1x128xf32>
    %223 = arith.truncf %201 : vector<1x128xf32> to vector<1x128xbf16>
    %cst_141 = arith.constant dense<0.000000e+00> : vector<1x128xf32>
    %224 = tpu.matmul %223, %122, %cst_141 {dimension_numbers = #tpu.dot_dimension_numbers<[1], [0], [0], [1], [0, 0, 1, 1], [], []>} : vector<1x128xbf16>, vector<128x128xbf16>, vector<1x128xf32> -> vector<1x128xf32>
    %225 = arith.addf %222, %224 : vector<1x128xf32>
    %226 = arith.addf %225, %123 : vector<1x128xf32>
    %c8_i32_142 = arith.constant 8 : i32
    %227 = arith.muli %arg0, %c8_i32_142 : i32
    %c3_i32 = arith.constant 3 : i32
    %228 = arith.addi %227, %c3_i32 : i32
    %229 = arith.index_cast %228 : i32 to index
    %230 = memref.load %arg1[%229] : memref<8xi32, #tpu.memory_space<smem>>
    %c3 = arith.constant 3 : index
    %c0_143 = arith.constant 0 : index
    %231 = tpu.strided_load %arg12[%c3, %c0_143] {strides = array<i32: 8, 1>} : memref<64x128xf32, #tpu.memory_space<vmem>>, vector<8x128xf32>
    %c8_i32_144 = arith.constant 8 : i32
    %232 = arith.muli %230, %c8_i32_144 : i32
    %c3_i32_145 = arith.constant 3 : i32
    %233 = arith.addi %232, %c3_i32_145 : i32
    %234 = arith.index_cast %233 : i32 to index
    %c0_146 = arith.constant 0 : index
    %235 = vector.load %arg12[%234, %c0_146] : memref<64x128xf32, #tpu.memory_space<vmem>>, vector<1x128xf32>
    %236 = arith.truncf %231 : vector<8x128xf32> to vector<8x128xbf16>
    %237 = arith.truncf %235 : vector<1x128xf32> to vector<1x128xbf16>
    %cst_147 = arith.constant dense<0.000000e+00> : vector<1x8xf32>
    %238 = tpu.matmul %237, %236, %cst_147 {dimension_numbers = #tpu.dot_dimension_numbers<[1], [1], [0], [0], [0, 0, 1, 0], [], []>} : vector<1x128xbf16>, vector<8x128xbf16>, vector<1x8xf32> -> vector<1x8xf32>
    %239 = vector.broadcast %230 : i32 to vector<1x8xi32>
    %240 = arith.cmpi slt, %124, %239 : vector<1x8xi32>
    %cst_148 = arith.constant -1.000000e+09 : f32
    %241 = vector.broadcast %cst_148 : f32 to vector<1x8xf32>
    %242 = arith.select %240, %238, %241 : vector<1x8xi1>, vector<1x8xf32>
    %cst_149 = arith.constant dense<0xFF800000> : vector<1xf32>
    %243 = vector.multi_reduction <maximumf>, %242, %cst_149 [1] : vector<1x8xf32> to vector<1xf32>
    %244 = vector.shape_cast %243 : vector<1xf32> to vector<1x1xf32>
    %245 = vector.broadcast %244 : vector<1x1xf32> to vector<1x8xf32>
    %246 = arith.subf %242, %245 : vector<1x8xf32>
    %247 = math.exp %246 : vector<1x8xf32>
    %cst_150 = arith.constant dense<0.000000e+00> : vector<1xf32>
    %248 = vector.multi_reduction <add>, %247, %cst_150 [1] : vector<1x8xf32> to vector<1xf32>
    %249 = vector.shape_cast %248 : vector<1xf32> to vector<1x1xf32>
    %250 = tpu.reciprocal %249 {approx = true} : vector<1x1xf32> -> vector<1x1xf32>
    %251 = vector.broadcast %250 : vector<1x1xf32> to vector<1x8xf32>
    %252 = arith.mulf %247, %251 : vector<1x8xf32>
    %253 = arith.truncf %252 : vector<1x8xf32> to vector<1x8xbf16>
    %cst_151 = arith.constant dense<0.000000e+00> : vector<1x128xf32>
    %254 = tpu.matmul %253, %236, %cst_151 {dimension_numbers = #tpu.dot_dimension_numbers<[1], [0], [0], [1], [0, 0, 1, 1], [], []>} : vector<1x8xbf16>, vector<8x128xbf16>, vector<1x128xf32> -> vector<1x128xf32>
    %255 = arith.truncf %254 : vector<1x128xf32> to vector<1x128xbf16>
    %cst_152 = arith.constant dense<0.000000e+00> : vector<1x128xf32>
    %256 = tpu.matmul %255, %121, %cst_152 {dimension_numbers = #tpu.dot_dimension_numbers<[1], [0], [0], [1], [0, 0, 1, 1], [], []>} : vector<1x128xbf16>, vector<128x128xbf16>, vector<1x128xf32> -> vector<1x128xf32>
    %257 = arith.truncf %235 : vector<1x128xf32> to vector<1x128xbf16>
    %cst_153 = arith.constant dense<0.000000e+00> : vector<1x128xf32>
    %258 = tpu.matmul %257, %122, %cst_153 {dimension_numbers = #tpu.dot_dimension_numbers<[1], [0], [0], [1], [0, 0, 1, 1], [], []>} : vector<1x128xbf16>, vector<128x128xbf16>, vector<1x128xf32> -> vector<1x128xf32>
    %259 = arith.addf %256, %258 : vector<1x128xf32>
    %260 = arith.addf %259, %123 : vector<1x128xf32>
    %c8_i32_154 = arith.constant 8 : i32
    %261 = arith.muli %arg0, %c8_i32_154 : i32
    %c4_i32 = arith.constant 4 : i32
    %262 = arith.addi %261, %c4_i32 : i32
    %263 = arith.index_cast %262 : i32 to index
    %264 = memref.load %arg1[%263] : memref<8xi32, #tpu.memory_space<smem>>
    %c4 = arith.constant 4 : index
    %c0_155 = arith.constant 0 : index
    %265 = tpu.strided_load %arg12[%c4, %c0_155] {strides = array<i32: 8, 1>} : memref<64x128xf32, #tpu.memory_space<vmem>>, vector<8x128xf32>
    %c8_i32_156 = arith.constant 8 : i32
    %266 = arith.muli %264, %c8_i32_156 : i32
    %c4_i32_157 = arith.constant 4 : i32
    %267 = arith.addi %266, %c4_i32_157 : i32
    %268 = arith.index_cast %267 : i32 to index
    %c0_158 = arith.constant 0 : index
    %269 = vector.load %arg12[%268, %c0_158] : memref<64x128xf32, #tpu.memory_space<vmem>>, vector<1x128xf32>
    %270 = arith.truncf %265 : vector<8x128xf32> to vector<8x128xbf16>
    %271 = arith.truncf %269 : vector<1x128xf32> to vector<1x128xbf16>
    %cst_159 = arith.constant dense<0.000000e+00> : vector<1x8xf32>
    %272 = tpu.matmul %271, %270, %cst_159 {dimension_numbers = #tpu.dot_dimension_numbers<[1], [1], [0], [0], [0, 0, 1, 0], [], []>} : vector<1x128xbf16>, vector<8x128xbf16>, vector<1x8xf32> -> vector<1x8xf32>
    %273 = vector.broadcast %264 : i32 to vector<1x8xi32>
    %274 = arith.cmpi slt, %124, %273 : vector<1x8xi32>
    %cst_160 = arith.constant -1.000000e+09 : f32
    %275 = vector.broadcast %cst_160 : f32 to vector<1x8xf32>
    %276 = arith.select %274, %272, %275 : vector<1x8xi1>, vector<1x8xf32>
    %cst_161 = arith.constant dense<0xFF800000> : vector<1xf32>
    %277 = vector.multi_reduction <maximumf>, %276, %cst_161 [1] : vector<1x8xf32> to vector<1xf32>
    %278 = vector.shape_cast %277 : vector<1xf32> to vector<1x1xf32>
    %279 = vector.broadcast %278 : vector<1x1xf32> to vector<1x8xf32>
    %280 = arith.subf %276, %279 : vector<1x8xf32>
    %281 = math.exp %280 : vector<1x8xf32>
    %cst_162 = arith.constant dense<0.000000e+00> : vector<1xf32>
    %282 = vector.multi_reduction <add>, %281, %cst_162 [1] : vector<1x8xf32> to vector<1xf32>
    %283 = vector.shape_cast %282 : vector<1xf32> to vector<1x1xf32>
    %284 = tpu.reciprocal %283 {approx = true} : vector<1x1xf32> -> vector<1x1xf32>
    %285 = vector.broadcast %284 : vector<1x1xf32> to vector<1x8xf32>
    %286 = arith.mulf %281, %285 : vector<1x8xf32>
    %287 = arith.truncf %286 : vector<1x8xf32> to vector<1x8xbf16>
    %cst_163 = arith.constant dense<0.000000e+00> : vector<1x128xf32>
    %288 = tpu.matmul %287, %270, %cst_163 {dimension_numbers = #tpu.dot_dimension_numbers<[1], [0], [0], [1], [0, 0, 1, 1], [], []>} : vector<1x8xbf16>, vector<8x128xbf16>, vector<1x128xf32> -> vector<1x128xf32>
    %289 = arith.truncf %288 : vector<1x128xf32> to vector<1x128xbf16>
    %cst_164 = arith.constant dense<0.000000e+00> : vector<1x128xf32>
    %290 = tpu.matmul %289, %121, %cst_164 {dimension_numbers = #tpu.dot_dimension_numbers<[1], [0], [0], [1], [0, 0, 1, 1], [], []>} : vector<1x128xbf16>, vector<128x128xbf16>, vector<1x128xf32> -> vector<1x128xf32>
    %291 = arith.truncf %269 : vector<1x128xf32> to vector<1x128xbf16>
    %cst_165 = arith.constant dense<0.000000e+00> : vector<1x128xf32>
    %292 = tpu.matmul %291, %122, %cst_165 {dimension_numbers = #tpu.dot_dimension_numbers<[1], [0], [0], [1], [0, 0, 1, 1], [], []>} : vector<1x128xbf16>, vector<128x128xbf16>, vector<1x128xf32> -> vector<1x128xf32>
    %293 = arith.addf %290, %292 : vector<1x128xf32>
    %294 = arith.addf %293, %123 : vector<1x128xf32>
    %c8_i32_166 = arith.constant 8 : i32
    %295 = arith.muli %arg0, %c8_i32_166 : i32
    %c5_i32 = arith.constant 5 : i32
    %296 = arith.addi %295, %c5_i32 : i32
    %297 = arith.index_cast %296 : i32 to index
    %298 = memref.load %arg1[%297] : memref<8xi32, #tpu.memory_space<smem>>
    %c5 = arith.constant 5 : index
    %c0_167 = arith.constant 0 : index
    %299 = tpu.strided_load %arg12[%c5, %c0_167] {strides = array<i32: 8, 1>} : memref<64x128xf32, #tpu.memory_space<vmem>>, vector<8x128xf32>
    %c8_i32_168 = arith.constant 8 : i32
    %300 = arith.muli %298, %c8_i32_168 : i32
    %c5_i32_169 = arith.constant 5 : i32
    %301 = arith.addi %300, %c5_i32_169 : i32
    %302 = arith.index_cast %301 : i32 to index
    %c0_170 = arith.constant 0 : index
    %303 = vector.load %arg12[%302, %c0_170] : memref<64x128xf32, #tpu.memory_space<vmem>>, vector<1x128xf32>
    %304 = arith.truncf %299 : vector<8x128xf32> to vector<8x128xbf16>
    %305 = arith.truncf %303 : vector<1x128xf32> to vector<1x128xbf16>
    %cst_171 = arith.constant dense<0.000000e+00> : vector<1x8xf32>
    %306 = tpu.matmul %305, %304, %cst_171 {dimension_numbers = #tpu.dot_dimension_numbers<[1], [1], [0], [0], [0, 0, 1, 0], [], []>} : vector<1x128xbf16>, vector<8x128xbf16>, vector<1x8xf32> -> vector<1x8xf32>
    %307 = vector.broadcast %298 : i32 to vector<1x8xi32>
    %308 = arith.cmpi slt, %124, %307 : vector<1x8xi32>
    %cst_172 = arith.constant -1.000000e+09 : f32
    %309 = vector.broadcast %cst_172 : f32 to vector<1x8xf32>
    %310 = arith.select %308, %306, %309 : vector<1x8xi1>, vector<1x8xf32>
    %cst_173 = arith.constant dense<0xFF800000> : vector<1xf32>
    %311 = vector.multi_reduction <maximumf>, %310, %cst_173 [1] : vector<1x8xf32> to vector<1xf32>
    %312 = vector.shape_cast %311 : vector<1xf32> to vector<1x1xf32>
    %313 = vector.broadcast %312 : vector<1x1xf32> to vector<1x8xf32>
    %314 = arith.subf %310, %313 : vector<1x8xf32>
    %315 = math.exp %314 : vector<1x8xf32>
    %cst_174 = arith.constant dense<0.000000e+00> : vector<1xf32>
    %316 = vector.multi_reduction <add>, %315, %cst_174 [1] : vector<1x8xf32> to vector<1xf32>
    %317 = vector.shape_cast %316 : vector<1xf32> to vector<1x1xf32>
    %318 = tpu.reciprocal %317 {approx = true} : vector<1x1xf32> -> vector<1x1xf32>
    %319 = vector.broadcast %318 : vector<1x1xf32> to vector<1x8xf32>
    %320 = arith.mulf %315, %319 : vector<1x8xf32>
    %321 = arith.truncf %320 : vector<1x8xf32> to vector<1x8xbf16>
    %cst_175 = arith.constant dense<0.000000e+00> : vector<1x128xf32>
    %322 = tpu.matmul %321, %304, %cst_175 {dimension_numbers = #tpu.dot_dimension_numbers<[1], [0], [0], [1], [0, 0, 1, 1], [], []>} : vector<1x8xbf16>, vector<8x128xbf16>, vector<1x128xf32> -> vector<1x128xf32>
    %323 = arith.truncf %322 : vector<1x128xf32> to vector<1x128xbf16>
    %cst_176 = arith.constant dense<0.000000e+00> : vector<1x128xf32>
    %324 = tpu.matmul %323, %121, %cst_176 {dimension_numbers = #tpu.dot_dimension_numbers<[1], [0], [0], [1], [0, 0, 1, 1], [], []>} : vector<1x128xbf16>, vector<128x128xbf16>, vector<1x128xf32> -> vector<1x128xf32>
    %325 = arith.truncf %303 : vector<1x128xf32> to vector<1x128xbf16>
    %cst_177 = arith.constant dense<0.000000e+00> : vector<1x128xf32>
    %326 = tpu.matmul %325, %122, %cst_177 {dimension_numbers = #tpu.dot_dimension_numbers<[1], [0], [0], [1], [0, 0, 1, 1], [], []>} : vector<1x128xbf16>, vector<128x128xbf16>, vector<1x128xf32> -> vector<1x128xf32>
    %327 = arith.addf %324, %326 : vector<1x128xf32>
    %328 = arith.addf %327, %123 : vector<1x128xf32>
    %c8_i32_178 = arith.constant 8 : i32
    %329 = arith.muli %arg0, %c8_i32_178 : i32
    %c6_i32 = arith.constant 6 : i32
    %330 = arith.addi %329, %c6_i32 : i32
    %331 = arith.index_cast %330 : i32 to index
    %332 = memref.load %arg1[%331] : memref<8xi32, #tpu.memory_space<smem>>
    %c6 = arith.constant 6 : index
    %c0_179 = arith.constant 0 : index
    %333 = tpu.strided_load %arg12[%c6, %c0_179] {strides = array<i32: 8, 1>} : memref<64x128xf32, #tpu.memory_space<vmem>>, vector<8x128xf32>
    %c8_i32_180 = arith.constant 8 : i32
    %334 = arith.muli %332, %c8_i32_180 : i32
    %c6_i32_181 = arith.constant 6 : i32
    %335 = arith.addi %334, %c6_i32_181 : i32
    %336 = arith.index_cast %335 : i32 to index
    %c0_182 = arith.constant 0 : index
    %337 = vector.load %arg12[%336, %c0_182] : memref<64x128xf32, #tpu.memory_space<vmem>>, vector<1x128xf32>
    %338 = arith.truncf %333 : vector<8x128xf32> to vector<8x128xbf16>
    %339 = arith.truncf %337 : vector<1x128xf32> to vector<1x128xbf16>
    %cst_183 = arith.constant dense<0.000000e+00> : vector<1x8xf32>
    %340 = tpu.matmul %339, %338, %cst_183 {dimension_numbers = #tpu.dot_dimension_numbers<[1], [1], [0], [0], [0, 0, 1, 0], [], []>} : vector<1x128xbf16>, vector<8x128xbf16>, vector<1x8xf32> -> vector<1x8xf32>
    %341 = vector.broadcast %332 : i32 to vector<1x8xi32>
    %342 = arith.cmpi slt, %124, %341 : vector<1x8xi32>
    %cst_184 = arith.constant -1.000000e+09 : f32
    %343 = vector.broadcast %cst_184 : f32 to vector<1x8xf32>
    %344 = arith.select %342, %340, %343 : vector<1x8xi1>, vector<1x8xf32>
    %cst_185 = arith.constant dense<0xFF800000> : vector<1xf32>
    %345 = vector.multi_reduction <maximumf>, %344, %cst_185 [1] : vector<1x8xf32> to vector<1xf32>
    %346 = vector.shape_cast %345 : vector<1xf32> to vector<1x1xf32>
    %347 = vector.broadcast %346 : vector<1x1xf32> to vector<1x8xf32>
    %348 = arith.subf %344, %347 : vector<1x8xf32>
    %349 = math.exp %348 : vector<1x8xf32>
    %cst_186 = arith.constant dense<0.000000e+00> : vector<1xf32>
    %350 = vector.multi_reduction <add>, %349, %cst_186 [1] : vector<1x8xf32> to vector<1xf32>
    %351 = vector.shape_cast %350 : vector<1xf32> to vector<1x1xf32>
    %352 = tpu.reciprocal %351 {approx = true} : vector<1x1xf32> -> vector<1x1xf32>
    %353 = vector.broadcast %352 : vector<1x1xf32> to vector<1x8xf32>
    %354 = arith.mulf %349, %353 : vector<1x8xf32>
    %355 = arith.truncf %354 : vector<1x8xf32> to vector<1x8xbf16>
    %cst_187 = arith.constant dense<0.000000e+00> : vector<1x128xf32>
    %356 = tpu.matmul %355, %338, %cst_187 {dimension_numbers = #tpu.dot_dimension_numbers<[1], [0], [0], [1], [0, 0, 1, 1], [], []>} : vector<1x8xbf16>, vector<8x128xbf16>, vector<1x128xf32> -> vector<1x128xf32>
    %357 = arith.truncf %356 : vector<1x128xf32> to vector<1x128xbf16>
    %cst_188 = arith.constant dense<0.000000e+00> : vector<1x128xf32>
    %358 = tpu.matmul %357, %121, %cst_188 {dimension_numbers = #tpu.dot_dimension_numbers<[1], [0], [0], [1], [0, 0, 1, 1], [], []>} : vector<1x128xbf16>, vector<128x128xbf16>, vector<1x128xf32> -> vector<1x128xf32>
    %359 = arith.truncf %337 : vector<1x128xf32> to vector<1x128xbf16>
    %cst_189 = arith.constant dense<0.000000e+00> : vector<1x128xf32>
    %360 = tpu.matmul %359, %122, %cst_189 {dimension_numbers = #tpu.dot_dimension_numbers<[1], [0], [0], [1], [0, 0, 1, 1], [], []>} : vector<1x128xbf16>, vector<128x128xbf16>, vector<1x128xf32> -> vector<1x128xf32>
    %361 = arith.addf %358, %360 : vector<1x128xf32>
    %362 = arith.addf %361, %123 : vector<1x128xf32>
    %c8_i32_190 = arith.constant 8 : i32
    %363 = arith.muli %arg0, %c8_i32_190 : i32
    %c7_i32 = arith.constant 7 : i32
    %364 = arith.addi %363, %c7_i32 : i32
    %365 = arith.index_cast %364 : i32 to index
    %366 = memref.load %arg1[%365] : memref<8xi32, #tpu.memory_space<smem>>
    %c7 = arith.constant 7 : index
    %c0_191 = arith.constant 0 : index
    %367 = tpu.strided_load %arg12[%c7, %c0_191] {strides = array<i32: 8, 1>} : memref<64x128xf32, #tpu.memory_space<vmem>>, vector<8x128xf32>
    %c8_i32_192 = arith.constant 8 : i32
    %368 = arith.muli %366, %c8_i32_192 : i32
    %c7_i32_193 = arith.constant 7 : i32
    %369 = arith.addi %368, %c7_i32_193 : i32
    %370 = arith.index_cast %369 : i32 to index
    %c0_194 = arith.constant 0 : index
    %371 = vector.load %arg12[%370, %c0_194] : memref<64x128xf32, #tpu.memory_space<vmem>>, vector<1x128xf32>
    %372 = arith.truncf %367 : vector<8x128xf32> to vector<8x128xbf16>
    %373 = arith.truncf %371 : vector<1x128xf32> to vector<1x128xbf16>
    %cst_195 = arith.constant dense<0.000000e+00> : vector<1x8xf32>
    %374 = tpu.matmul %373, %372, %cst_195 {dimension_numbers = #tpu.dot_dimension_numbers<[1], [1], [0], [0], [0, 0, 1, 0], [], []>} : vector<1x128xbf16>, vector<8x128xbf16>, vector<1x8xf32> -> vector<1x8xf32>
    %375 = vector.broadcast %366 : i32 to vector<1x8xi32>
    %376 = arith.cmpi slt, %124, %375 : vector<1x8xi32>
    %cst_196 = arith.constant -1.000000e+09 : f32
    %377 = vector.broadcast %cst_196 : f32 to vector<1x8xf32>
    %378 = arith.select %376, %374, %377 : vector<1x8xi1>, vector<1x8xf32>
    %cst_197 = arith.constant dense<0xFF800000> : vector<1xf32>
    %379 = vector.multi_reduction <maximumf>, %378, %cst_197 [1] : vector<1x8xf32> to vector<1xf32>
    %380 = vector.shape_cast %379 : vector<1xf32> to vector<1x1xf32>
    %381 = vector.broadcast %380 : vector<1x1xf32> to vector<1x8xf32>
    %382 = arith.subf %378, %381 : vector<1x8xf32>
    %383 = math.exp %382 : vector<1x8xf32>
    %cst_198 = arith.constant dense<0.000000e+00> : vector<1xf32>
    %384 = vector.multi_reduction <add>, %383, %cst_198 [1] : vector<1x8xf32> to vector<1xf32>
    %385 = vector.shape_cast %384 : vector<1xf32> to vector<1x1xf32>
    %386 = tpu.reciprocal %385 {approx = true} : vector<1x1xf32> -> vector<1x1xf32>
    %387 = vector.broadcast %386 : vector<1x1xf32> to vector<1x8xf32>
    %388 = arith.mulf %383, %387 : vector<1x8xf32>
    %389 = arith.truncf %388 : vector<1x8xf32> to vector<1x8xbf16>
    %cst_199 = arith.constant dense<0.000000e+00> : vector<1x128xf32>
    %390 = tpu.matmul %389, %372, %cst_199 {dimension_numbers = #tpu.dot_dimension_numbers<[1], [0], [0], [1], [0, 0, 1, 1], [], []>} : vector<1x8xbf16>, vector<8x128xbf16>, vector<1x128xf32> -> vector<1x128xf32>
    %391 = arith.truncf %390 : vector<1x128xf32> to vector<1x128xbf16>
    %cst_200 = arith.constant dense<0.000000e+00> : vector<1x128xf32>
    %392 = tpu.matmul %391, %121, %cst_200 {dimension_numbers = #tpu.dot_dimension_numbers<[1], [0], [0], [1], [0, 0, 1, 1], [], []>} : vector<1x128xbf16>, vector<128x128xbf16>, vector<1x128xf32> -> vector<1x128xf32>
    %393 = arith.truncf %371 : vector<1x128xf32> to vector<1x128xbf16>
    %cst_201 = arith.constant dense<0.000000e+00> : vector<1x128xf32>
    %394 = tpu.matmul %393, %122, %cst_201 {dimension_numbers = #tpu.dot_dimension_numbers<[1], [0], [0], [1], [0, 0, 1, 1], [], []>} : vector<1x128xbf16>, vector<128x128xbf16>, vector<1x128xf32> -> vector<1x128xf32>
    %395 = arith.addf %392, %394 : vector<1x128xf32>
    %396 = arith.addf %395, %123 : vector<1x128xf32>
    %397 = tpu.concatenate %158, %192, %226, %260, %294, %328, %362, %396 in 0 : vector<1x128xf32>, vector<1x128xf32>, vector<1x128xf32>, vector<1x128xf32>, vector<1x128xf32>, vector<1x128xf32>, vector<1x128xf32>, vector<1x128xf32> -> vector<8x128xf32>
    %c0_202 = arith.constant 0 : index
    %c0_203 = arith.constant 0 : index
    %398 = vector.load %arg11[%c0_202, %c0_203] : memref<8x128xf32, #tpu.memory_space<vmem>>, vector<8x128xf32>
    tpu.vector_store %arg11[%c0_202, %c0_203], %397 {strides = array<i32>} : memref<8x128xf32, #tpu.memory_space<vmem>>, vector<8x128xf32>,
    return
  }
  func.func @transform_0(%arg0: i32, %arg1: memref<8xi32, #tpu.memory_space<smem>>) -> (i32, i32, i32) {
    %c0_i32 = arith.constant 0 : i32
    %c0_i32_0 = arith.constant 0 : i32
    %c0_i32_1 = arith.constant 0 : i32
    return %c0_i32, %arg0, %c0_i32_0 : i32, i32, i32
  }
  func.func @transform_1(%arg0: i32, %arg1: memref<8xi32, #tpu.memory_space<smem>>) -> (i32, i32) {
    %c0_i32 = arith.constant 0 : i32
    %c0_i32_0 = arith.constant 0 : i32
    %c0_i32_1 = arith.constant 0 : i32
    return %c0_i32, %c0_i32_0 : i32, i32
  }
  func.func @transform_2(%arg0: i32, %arg1: memref<8xi32, #tpu.memory_space<smem>>) -> (i32, i32) {
    %c0_i32 = arith.constant 0 : i32
    %c0_i32_0 = arith.constant 0 : i32
    %c0_i32_1 = arith.constant 0 : i32
    return %c0_i32, %c0_i32_0 : i32, i32
  }
  func.func @transform_3(%arg0: i32, %arg1: memref<8xi32, #tpu.memory_space<smem>>) -> (i32, i32, i32) {
    %c0_i32 = arith.constant 0 : i32
    %c0_i32_0 = arith.constant 0 : i32
    %c0_i32_1 = arith.constant 0 : i32
    %c0_i32_2 = arith.constant 0 : i32
    return %c0_i32, %c0_i32_0, %c0_i32_1 : i32, i32, i32
  }
  func.func @transform_4(%arg0: i32, %arg1: memref<8xi32, #tpu.memory_space<smem>>) -> (i32, i32, i32) {
    %c0_i32 = arith.constant 0 : i32
    %c0_i32_0 = arith.constant 0 : i32
    %c0_i32_1 = arith.constant 0 : i32
    %c0_i32_2 = arith.constant 0 : i32
    return %c0_i32, %c0_i32_0, %c0_i32_1 : i32, i32, i32
  }
  func.func @transform_5(%arg0: i32, %arg1: memref<8xi32, #tpu.memory_space<smem>>) -> (i32, i32, i32) {
    %c0_i32 = arith.constant 0 : i32
    %c0_i32_0 = arith.constant 0 : i32
    %c0_i32_1 = arith.constant 0 : i32
    %c0_i32_2 = arith.constant 0 : i32
    return %c0_i32, %c0_i32_0, %c0_i32_1 : i32, i32, i32
  }
  func.func @transform_6(%arg0: i32, %arg1: memref<8xi32, #tpu.memory_space<smem>>) -> (i32, i32) {
    %c0_i32 = arith.constant 0 : i32
    %c0_i32_0 = arith.constant 0 : i32
    %c0_i32_1 = arith.constant 0 : i32
    return %c0_i32, %c0_i32_0 : i32, i32
  }
  func.func @transform_7(%arg0: i32, %arg1: memref<8xi32, #tpu.memory_space<smem>>) -> (i32, i32) {
    %c0_i32 = arith.constant 0 : i32
    %c0_i32_0 = arith.constant 0 : i32
    %c0_i32_1 = arith.constant 0 : i32
    return %c0_i32, %c0_i32_0 : i32, i32
  }
  func.func @transform_8(%arg0: i32, %arg1: memref<8xi32, #tpu.memory_space<smem>>) -> (i32, i32) {
    %c0_i32 = arith.constant 0 : i32
    %c0_i32_0 = arith.constant 0 : i32
    %c0_i32_1 = arith.constant 0 : i32
    return %c0_i32, %c0_i32_0 : i32, i32
  }
  func.func @transform_9(%arg0: i32, %arg1: memref<8xi32, #tpu.memory_space<smem>>) -> (i32, i32) {
    %c0_i32 = arith.constant 0 : i32
    %c0_i32_0 = arith.constant 0 : i32
    return %arg0, %c0_i32 : i32, i32
  }
}

</mosaic_0001>

<bundles_post_ra>
// kernel: attnlm_forward.1
= control target key start
LH: loop header
LB: loop body
LE: loop exit
PB: predicated region body
PF: predicated region fallthrough
CT: control target
= control target key end

     0   :  { %s1949_s16 = smov [#allocation4]   ;;  %s2680_s0 = inlined_call_operand.vmem [shape: s32[8], index: 0, kind: input, shape index: {}]   ;;  %s2681_s1 = inlined_call_operand.vmem [shape: f32[8,8,128], index: 1, kind: input, shape index: {}]   ;;  %s2682_s2 = inlined_call_operand.vmem [shape: bf16[128,128], index: 2, kind: input, shape index: {}]   ;;  %s2683_s3 = inlined_call_operand.vmem [shape: f32[1,128], index: 3, kind: input, shape index: {}]   ;;  %s2684_s4 = inlined_call_operand.vmem [shape: bf16[1,128,128], index: 4, kind: input, shape index: {}]   ;;  %s2685_s5 = inlined_call_operand.vmem [shape: f32[1,1,128], index: 5, kind: input, shape index: {}]   ;;  %s2686_s6 = inlined_call_operand.vmem [shape: bf16[2,128,128], index: 6, kind: input, shape index: {}]   ;;  %s2687_s7 = inlined_call_operand.vmem [shape: bf16[128,128], index: 7, kind: input, shape index: {}]   ;;  %s2688_s8 = inlined_call_operand.vmem [shape: bf16[128,128], index: 8, kind: input, shape index: {}]   ;;  %s2689_s9 = inlined_call_operand.vmem [shape: f32[1,128], index: 9, kind: input, shape index: {}]   ;;  %s2690_s10 = inlined_call_operand.vmem [shape: f32[8,128], index: 10, kind: output, shape index: {}]  }
   0x1   :  { %s16_s15 = sshll.u32 %s2680_s0, 4  ;;  %s17_s15 = int_to_ptr.vmem [resolvable:$true] %s16_s15 }
   0x2   :  { %19 = dma.vmem_to_smem %s17_s15, 16, %s1949_s16, [#allocation3] }
   0x3   :  { %1947 = dma.done.wait [#allocation3], 16 }
   0x4   :  { %1948 = vsyncadd [#allocation3], 4294967280 }
   0x5   :  { %22 = sfence }
   0x6   :  { %v1826_v0 = vld [vmem:[%s2682_s2 + $0x38] sm:$0xff]  ;;  %v1825_v2 = vld [vmem:[%s2682_s2 + $0x30] sm:$0xff]  ;;  %v1824_v4 = vld [vmem:[%s2682_s2 + $0x28] sm:$0xff]  ;;  %v1950_v19 = vmov 0   ;;  %s2289_s30 = sld [smem:[#allocation4 + $0x1]]  ;;  %vm769_vm0 = vcmask 1043456  }
   0x7   :  { %v2015_v1 = vld [vmem:[%s2686_s6 + $0x38] sm:$0xff]  ;;  %122 = vmatpush.bf16.msra.mxu0 %v1826_v0  ;;  %v2024_v3 = vld [vmem:[%s2686_s6 + $0x30] sm:$0xff]  ;;  %v2035_v5 = vld [vmem:[%s2686_s6 + $0x28] sm:$0xff]  ;;  %s2354_s27 = sld [smem:[#allocation4 + $0x2]]  ;;  %vm752_vm2 = vcmask 57344   ;;  %vm765_vm10 = vcmask 64512  }
   0x8   :  { %224 = vmatpush.bf16.msra.mxu1 %v2015_v1  ;;  %242 = vmatpush.bf16.msra.mxu2 %v2015_v1  ;;  %v1823_v6 = vld [vmem:[%s2682_s2 + $0x20] sm:$0xff]  ;;  %v1822_v8 = vld [vmem:[%s2682_s2 + $0x18] sm:$0xff]  ;;  %v1821_v10 = vld [vmem:[%s2682_s2 + $0x10] sm:$0xff]  ;;  %vm1540_vm11 = vcmask 1040384   ;;  %vm1542_vm12 = vcmask 1041408   ;;  %vm1544_vm13 = vcmask 1042432  }
   0x9   :  { %260 = vmatpush.bf16.msra.mxu3 %v2015_v1  ;;  %v2046_v7 = vld [vmem:[%s2686_s6 + $0x20] sm:$0xff]  ;;  %v2057_v9 = vld [vmem:[%s2686_s6 + $0x18] sm:$0xff]  ;;  %v1829_v11 = vld [vmem:[%s2686_s6 + $0x10] sm:$0xff]  ;;  %vm1547_vm14 = vcmask 1044480   ;;  %vm1549_vm15 = vcmask 1045504  }
   0xa   :  { %v1820_v12 = vld [vmem:[%s2682_s2 + $0x8] sm:$0xff]  ;;  %v1819_v14 = vld [vmem:[%s2682_s2] sm:$0xff]  ;;  %v44_v20 = vld [vmem:[%s2681_s1 + $0x10] sm:$0xff] }
   0xb   :  { %123 = vmatpush.bf16.msra.mxu0 %v1825_v2  ;;  %v1828_v13 = vld [vmem:[%s2686_s6 + $0x8] sm:$0xff]  ;;  %v1827_v15 = vld [vmem:[%s2686_s6] sm:$0xff]  ;;  %v45_v21 = vld [vmem:[%s2681_s1 + $0x18] sm:$0xff] }
   0xc   :  { %225 = vmatpush.bf16.msra.mxu1 %v2024_v3  ;;  %243 = vmatpush.bf16.msra.mxu2 %v2024_v3  ;;  %v42_v16 = vld [vmem:[%s2681_s1] sm:$0xff]  ;;  %v43_v17 = vld [vmem:[%s2681_s1 + $0x8] sm:$0xff]  ;;  %v51_v22 = vpack.c.bf16 %v45_v21, %v44_v20  ;;  %v1842_v38 = vld [vmem:[%s2684_s4 + $0x38] sm:$0xff]  ;;  %s1792_s11 = sshll.u32 %s2289_s30, 3 }
   0xd   :  { %261 = vmatpush.bf16.msra.mxu3 %v2024_v3  ;;  %v50_v18 = vpack.c.bf16 %v43_v17, %v42_v16  ;;  %v2123_v23 = vld [vmem:[%s2683_s3] ss:$0 sm:$0xff]  ;;  %v47_v40 = vld [vmem:[%s2681_s1 + $0x28] sm:$0xff]  ;;  %v1841_v49 = vld [vmem:[%s2684_s4 + $0x30] sm:$0xff]  ;;  %s1561_s3 = scalar_lea.vmem [#allocation2], %s1792_s11  ;;  %s2386_s11 = sld [smem:[#allocation4 + $0x5]] }
   0xe   :  { %v46_v39 = vld [vmem:[%s2681_s1 + $0x20] sm:$0xff]  ;;  %v1840_v50 = vld [vmem:[%s2684_s4 + $0x28] sm:$0xff]  ;;  %v1838_v52 = vld [vmem:[%s2684_s4 + $0x18] sm:$0xff] }
   0xf   :  { %124 = vmatpush.bf16.msra.mxu0 %v1824_v4  ;;  %v52_v41 = vpack.c.bf16 %v47_v40, %v46_v39  ;;  %v1839_v51 = vld [vmem:[%s2684_s4 + $0x20] sm:$0xff]  ;;  %v1837_v53 = vld [vmem:[%s2684_s4 + $0x10] sm:$0xff]  ;;  %v1836_v54 = vld [vmem:[%s2684_s4 + $0x8] sm:$0xff] }
  0x10   :  { %226 = vmatpush.bf16.msra.mxu1 %v2035_v5  ;;  %244 = vmatpush.bf16.msra.mxu2 %v2035_v5  ;;  %v1835_v55 = vld [vmem:[%s2684_s4] sm:$0xff]  ;;  %v2162_v63 = vld [vmem:[%s2686_s6 + $0x78] sm:$0xff]  ;;  %v2171_v2 = vld [vmem:[%s2686_s6 + $0x70] sm:$0xff] }
  0x11   :  { %262 = vmatpush.bf16.msra.mxu3 %v2035_v5  ;;  %v2189_v4 = vld [vmem:[%s2686_s6 + $0x60] sm:$0xff]  ;;  %v49_v16 = vld [vmem:[%s2681_s1 + $0x38] sm:$0xff] }
  0x13   :  { %125 = vmatpush.bf16.msra.mxu0 %v1823_v6  ;;  %v2207_v6 = vld [vmem:[%s2686_s6 + $0x50] sm:$0xff]  ;;  %s1808_s13 = sshll.u32 %s2386_s11, 3 }
  0x14   :  { %227 = vmatpush.bf16.msra.mxu1 %v2046_v7  ;;  %245 = vmatpush.bf16.msra.mxu2 %v2046_v7  ;;  %s1573_s4 = scalar_lea.vmem [#allocation2], %s1808_s13 }
  0x15   :  { %263 = vmatpush.bf16.msra.mxu3 %v2046_v7 }
  0x17   :  { %126 = vmatpush.bf16.msra.mxu0 %v1822_v8  ;;  %v2225_v8 = vld [vmem:[%s2686_s6 + $0x40] sm:$0xff] }
  0x18   :  { %228 = vmatpush.bf16.msra.mxu1 %v2057_v9  ;;  %246 = vmatpush.bf16.msra.mxu2 %v2057_v9 }
  0x19   :  { %264 = vmatpush.bf16.msra.mxu3 %v2057_v9 }
  0x1b   :  { %127 = vmatpush.bf16.msra.mxu0 %v1821_v10 }
  0x1c   :  { %229 = vmatpush.bf16.msra.mxu1 %v1829_v11  ;;  %247 = vmatpush.bf16.msra.mxu2 %v1829_v11 }
  0x1d   :  { %265 = vmatpush.bf16.msra.mxu3 %v1829_v11 }
  0x1f   :  { %128 = vmatpush.bf16.msra.mxu0 %v1820_v12 }
  0x20   :  { %230 = vmatpush.bf16.msra.mxu1 %v1828_v13  ;;  %248 = vmatpush.bf16.msra.mxu2 %v1828_v13 }
  0x21   :  { %266 = vmatpush.bf16.msra.mxu3 %v1828_v13 }
  0x23   :  { %129 = vmatpush.bf16.msra.mxu0 %v1819_v14 }
  0x24   :  { %231 = vmatpush.bf16.msra.mxu1 %v1827_v15  ;;  %249 = vmatpush.bf16.msra.mxu2 %v1827_v15 }
  0x25   :  { %267 = vmatpush.bf16.msra.mxu3 %v1827_v15 }
  0x26   :  { %130 = vmatmul.bf16.vlgmr.msra.gmra.mxu0 %v50_v18 }
  0x27   :  { %232 = vmatmul.bf16.vlgmr.msra.gmra.mxu1 %v1950_v19  ;;  %332 = vmatpush.bf16.msrb.mxu0 %v2015_v1 }
  0x28   :  { %278 = vmatpush.bf16.msrb.mxu1 %v2015_v1  ;;  %296 = vmatpush.bf16.msrb.mxu2 %v2015_v1 }
  0x29   :  { %314 = vmatpush.bf16.msrb.mxu3 %v2015_v1 }
  0x2b   :  { %333 = vmatpush.bf16.msrb.mxu0 %v2024_v3 }
  0x2c   :  { %279 = vmatpush.bf16.msrb.mxu1 %v2024_v3  ;;  %297 = vmatpush.bf16.msrb.mxu2 %v2024_v3 }
  0x2d   :  { %315 = vmatpush.bf16.msrb.mxu3 %v2024_v3 }
  0x2f   :  { %334 = vmatpush.bf16.msrb.mxu0 %v2035_v5 }
  0x30   :  { %280 = vmatpush.bf16.msrb.mxu1 %v2035_v5  ;;  %298 = vmatpush.bf16.msrb.mxu2 %v2035_v5 }
  0x31   :  { %316 = vmatpush.bf16.msrb.mxu3 %v2035_v5 }
  0x33   :  { %335 = vmatpush.bf16.msrb.mxu0 %v2046_v7 }
  0x34   :  { %281 = vmatpush.bf16.msrb.mxu1 %v2046_v7  ;;  %299 = vmatpush.bf16.msrb.mxu2 %v2046_v7 }
  0x35   :  { %317 = vmatpush.bf16.msrb.mxu3 %v2046_v7 }
  0x36   :  { %135 = vmatmul.bf16.gmra.mxu0 %v51_v22 }
  0x37   :  { %336 = vmatpush.bf16.msrb.mxu0 %v2057_v9 }
  0x38   :  { %282 = vmatpush.bf16.msrb.mxu1 %v2057_v9  ;;  %300 = vmatpush.bf16.msrb.mxu2 %v2057_v9 }
  0x39   :  { %318 = vmatpush.bf16.msrb.mxu3 %v2057_v9 }
  0x3b   :  { %337 = vmatpush.bf16.msrb.mxu0 %v1829_v11 }
  0x3c   :  { %283 = vmatpush.bf16.msrb.mxu1 %v1829_v11  ;;  %301 = vmatpush.bf16.msrb.mxu2 %v1829_v11 }
  0x3d   :  { %319 = vmatpush.bf16.msrb.mxu3 %v1829_v11 }
  0x3f   :  { %338 = vmatpush.bf16.msrb.mxu0 %v1828_v13 }
  0x40   :  { %284 = vmatpush.bf16.msrb.mxu1 %v1828_v13  ;;  %302 = vmatpush.bf16.msrb.mxu2 %v1828_v13 }
  0x41   :  { %320 = vmatpush.bf16.msrb.mxu3 %v1828_v13 }
  0x43   :  { %339 = vmatpush.bf16.msrb.mxu0 %v1827_v15 }
  0x44   :  { %285 = vmatpush.bf16.msrb.mxu1 %v1827_v15  ;;  %303 = vmatpush.bf16.msrb.mxu2 %v1827_v15 }
  0x45   :  { %321 = vmatpush.bf16.msrb.mxu3 %v1827_v15 }
  0x46   :  { %140 = vmatmul.bf16.gmra.mxu0 %v52_v41 }
  0x47   :  { %567 = vmatpush.bf16.msra.mxu0 %v2162_v63 }
  0x48   :  { %350 = vmatpush.bf16.msra.mxu1 %v2015_v1 }
  0x4b   :  { %568 = vmatpush.bf16.msra.mxu0 %v2171_v2 }
  0x4c   :  { %351 = vmatpush.bf16.msra.mxu1 %v2024_v3  ;;  %v2180_v3 = vld [vmem:[%s2686_s6 + $0x68] sm:$0xff] }
  0x4f   :  { %569 = vmatpush.bf16.msra.mxu0 %v2180_v3 }
  0x50   :  { %352 = vmatpush.bf16.msra.mxu1 %v2035_v5  ;;  %v2198_v5 = vld [vmem:[%s2686_s6 + $0x58] sm:$0xff] }
  0x53   :  { %570 = vmatpush.bf16.msra.mxu0 %v2189_v4 }
  0x54   :  { %353 = vmatpush.bf16.msra.mxu1 %v2046_v7  ;;  %v2213_v7 = vld [vmem:[%s2686_s6 + $0x48] sm:$0xff]  ;;  %s2358_s6 = sld [smem:[#allocation4 + $0x3]] }
  0x57   :  { %571 = vmatpush.bf16.msra.mxu0 %v2198_v5 }
  0x58   :  { %354 = vmatpush.bf16.msra.mxu1 %v2057_v9 }
  0x5a   :  { %s1800_s28 = sshll.u32 %s2358_s6, 3 }
  0x5b   :  { %572 = vmatpush.bf16.msra.mxu0 %v2207_v6  ;;  %s1567_s29 = scalar_lea.vmem [#allocation2], %s1800_s28 }
  0x5c   :  { %355 = vmatpush.bf16.msra.mxu1 %v1829_v11 }
  0x5f   :  { %573 = vmatpush.bf16.msra.mxu0 %v2213_v7 }
  0x60   :  { %356 = vmatpush.bf16.msra.mxu1 %v1828_v13 }
  0x63   :  { %574 = vmatpush.bf16.msra.mxu0 %v2225_v8 }
  0x64   :  { %357 = vmatpush.bf16.msra.mxu1 %v1827_v15  ;;  %v48_v15 = vld [vmem:[%s2681_s1 + $0x30] sm:$0xff] }
  0x65   :  { %v53_v18 = vpack.c.bf16 %v49_v16, %v48_v15 }
  0x67   :  { %145 = vmatmul.bf16.gmra.mxu0 %v53_v18 }
  0xa3   :  { %v131_v24 = vpop.f32.mrf.mxu0 }
  0xa4   :  { %v233_v25 = vpop.f32.mrf.mxu1  ;;  %v132_v26 = vadd.f32 %v2123_v23, %v131_v24 }
  0xa6   :  { %v237_v27 = vadd.f32 %v233_v25, %v132_v26 }
  0xa8   :  { %1871 = vtanh.f32 %v237_v27 }
  0xab   :  { %v133_v31 = vpop.f32.mrf.mxu0 }
  0xac   :  { %v235_v28 = vpop.f32.mrf.mxu1  ;;  %v134_v32 = vadd.f32 %v2123_v23, %v133_v31 }
  0xad   :  { %v2259_v28 = vld [vmem:[%s2685_s5] ss:$0 sm:$0xff]  ;;  %s2287_s5 = sld [smem:[#allocation4]] }
  0xae   :  { %v1872_v29 = vpop.eup %1871 }
  0xaf   :  { %v241_v30 = vpack.c.bf16 %v1872_v29, %v1872_v29 }
  0xb1   :  { %250 = vmatmul.bf16.vlgmr.msra.gmra.mxu2 %v241_v30 }
  0xb2   :  { %446 = vmatpush.bf16.msra.mxu2 %v1842_v38 }
  0xb3   :  { %v136_v42 = vpop.f32.mrf.mxu0  ;;  %s1725_s2 = sshll.u32 %s2287_s5, 3 }
  0xb4   :  { %v137_v43 = vadd.f32 %v2123_v23, %v136_v42  ;;  %s732_s15 = scalar_lea.vmem [#allocation2], %s1725_s2  ;;  %s2382_s2 = sld [smem:[#allocation4 + $0x4]] }
  0xb6   :  { %447 = vmatpush.bf16.msra.mxu2 %v1841_v49 }
  0xba   :  { %448 = vmatpush.bf16.msra.mxu2 %v1840_v50  ;;  %s1804_s12 = sshll.u32 %s2382_s2, 3 }
  0xbb   :  { %v138_v56 = vpop.f32.mrf.mxu0  ;;  %s1570_s14 = scalar_lea.vmem [#allocation2], %s1804_s12 }
  0xbc   :  { %v139_v57 = vadd.f32 %v2123_v23, %v138_v56 }
  0xbe   :  { %449 = vmatpush.bf16.msra.mxu2 %v1839_v51 }
  0xc2   :  { %450 = vmatpush.bf16.msra.mxu2 %v1838_v52 }
  0xc3   :  { %v141_v9 = vpop.f32.mrf.mxu0 }
  0xc4   :  { %v142_v10 = vadd.f32 %v2123_v23, %v141_v9 }
  0xc6   :  { %451 = vmatpush.bf16.msra.mxu2 %v1837_v53 }
  0xca   :  { %452 = vmatpush.bf16.msra.mxu2 %v1836_v54 }
  0xce   :  { %453 = vmatpush.bf16.msra.mxu2 %v1835_v55 }
 0x134   :  { %v251_v33 = vpop.f32.mrf.mxu2 }
 0x135   :  { %v255_v34 = vadd.f32 %v251_v33, %v134_v32 }
 0x137   :  { %1873 = vtanh.f32 %v255_v34 }
 0x13c   :  { %v253_v35 = vpop.f32.mrf.mxu2 }
 0x13d   :  { %v1874_v36 = vpop.eup %1873 }
 0x13e   :  { %v259_v37 = vpack.c.bf16 %v1874_v36, %v1874_v36  ;;  %v374_v0 = vpack.c.bf16 %v1874_v36, %v1872_v29 }
 0x140   :  { %268 = vmatmul.bf16.vlgmr.msra.gmra.mxu3 %v259_v37 }
 0x141   :  { %549 = vmatpush.bf16.msra.mxu3 %v2162_v63 }
 0x145   :  { %550 = vmatpush.bf16.msra.mxu3 %v2171_v2 }
 0x149   :  { %551 = vmatpush.bf16.msra.mxu3 %v2180_v3 }
 0x14d   :  { %552 = vmatpush.bf16.msra.mxu3 %v2189_v4 }
 0x151   :  { %553 = vmatpush.bf16.msra.mxu3 %v2198_v5 }
 0x155   :  { %554 = vmatpush.bf16.msra.mxu3 %v2207_v6 }
 0x159   :  { %555 = vmatpush.bf16.msra.mxu3 %v2213_v7 }
 0x15d   :  { %556 = vmatpush.bf16.msra.mxu3 %v2225_v8 }
 0x1c3   :  { %v269_v44 = vpop.f32.mrf.mxu3 }
 0x1c4   :  { %v273_v45 = vadd.f32 %v269_v44, %v137_v43 }
 0x1c6   :  { %1875 = vtanh.f32 %v273_v45 }
 0x1cb   :  { %v271_v46 = vpop.f32.mrf.mxu3 }
 0x1cc   :  { %v1876_v47 = vpop.eup %1875 }
 0x1cd   :  { %v277_v48 = vpack.c.bf16 %v1876_v47, %v1876_v47 }
 0x1cf   :  { %286 = vmatmul.bf16.vlgmr.msrb.gmra.mxu1 %v277_v48 }
 0x1d0   :  { %585 = vmatpush.bf16.msrb.mxu1 %v2162_v63 }
 0x1d4   :  { %586 = vmatpush.bf16.msrb.mxu1 %v2171_v2 }
 0x1d8   :  { %587 = vmatpush.bf16.msrb.mxu1 %v2180_v3 }
 0x1dc   :  { %588 = vmatpush.bf16.msrb.mxu1 %v2189_v4 }
 0x1e0   :  { %589 = vmatpush.bf16.msrb.mxu1 %v2198_v5 }
 0x1e4   :  { %590 = vmatpush.bf16.msrb.mxu1 %v2207_v6 }
 0x1e8   :  { %591 = vmatpush.bf16.msrb.mxu1 %v2213_v7 }
 0x1ec   :  { %592 = vmatpush.bf16.msrb.mxu1 %v2225_v8 }
 0x24c   :  { %v287_v58 = vpop.f32.mrf.mxu1 }
 0x24d   :  { %v291_v59 = vadd.f32 %v287_v58, %v139_v57 }
 0x24f   :  { %1877 = vtanh.f32 %v291_v59 }
 0x254   :  { %v289_v60 = vpop.f32.mrf.mxu1 }
 0x255   :  { %v1878_v61 = vpop.eup %1877 }
 0x256   :  { %v295_v62 = vpack.c.bf16 %v1878_v61, %v1878_v61  ;;  %v375_v1 = vpack.c.bf16 %v1878_v61, %v1876_v47 }
 0x258   :  { %304 = vmatmul.bf16.vlgmr.msrb.gmra.mxu2 %v295_v62 }
 0x259   :  { %657 = vmatpush.bf16.msrb.mxu2 %v2162_v63 }
 0x25d   :  { %658 = vmatpush.bf16.msrb.mxu2 %v2171_v2 }
 0x261   :  { %659 = vmatpush.bf16.msrb.mxu2 %v2180_v3 }
 0x265   :  { %660 = vmatpush.bf16.msrb.mxu2 %v2189_v4 }
 0x268   :  { %454 = vmatmul.bf16.vlgmr.msra.gmra.mxu2 %v374_v0 }
 0x269   :  { %661 = vmatpush.bf16.msrb.mxu2 %v2198_v5 }
 0x26d   :  { %662 = vmatpush.bf16.msrb.mxu2 %v2207_v6 }
 0x271   :  { %663 = vmatpush.bf16.msrb.mxu2 %v2213_v7 }
 0x275   :  { %664 = vmatpush.bf16.msrb.mxu2 %v2225_v8 }
 0x278   :  { %459 = vmatmul.bf16.gmra.mxu2 %v375_v1 }
 0x2db   :  { %v305_v11 = vpop.f32.mrf.mxu2 }
 0x2dc   :  { %v309_v12 = vadd.f32 %v305_v11, %v142_v10 }
 0x2de   :  { %1879 = vtanh.f32 %v309_v12 }
 0x2e3   :  { %v307_v13 = vpop.f32.mrf.mxu2 }
 0x2e4   :  { %v1880_v14 = vpop.eup %1879 }
 0x2e5   :  { %v313_v17 = vpack.c.bf16 %v1880_v14, %v1880_v14 }
 0x2e7   :  { %322 = vmatmul.bf16.vlgmr.msrb.gmra.mxu3 %v313_v17 }
 0x2e8   :  { %603 = vmatpush.bf16.msrb.mxu3 %v2162_v63 }
 0x2eb   :  { %v455_v29 = vpop.f32.mrf.mxu2 }
 0x2ec   :  { %604 = vmatpush.bf16.msrb.mxu3 %v2171_v2  ;;  %v456_v30 = vadd.f32 %v2259_v28, %v455_v29 }
 0x2f0   :  { %605 = vmatpush.bf16.msrb.mxu3 %v2180_v3 }
 0x2f3   :  { %v457_v44 = vpop.f32.mrf.mxu2 }
 0x2f4   :  { %606 = vmatpush.bf16.msrb.mxu3 %v2189_v4  ;;  %v458_v45 = vadd.f32 %v2259_v28, %v457_v44 }
 0x2f7   :  { %557 = vmatmul.bf16.vlgmr.msra.gmra.mxu3 %v1950_v19  ;;  %v143_v19 = vpop.f32.mrf.mxu0 }
 0x2f8   :  { %607 = vmatpush.bf16.msrb.mxu3 %v2198_v5  ;;  %v144_v20 = vadd.f32 %v2123_v23, %v143_v19 }
 0x2fb   :  { %v460_v57 = vpop.f32.mrf.mxu2 }
 0x2fc   :  { %608 = vmatpush.bf16.msrb.mxu3 %v2207_v6  ;;  %v461_v58 = vadd.f32 %v2259_v28, %v460_v57 }
 0x2ff   :  { %v146_v36 = vpop.f32.mrf.mxu0 }
 0x300   :  { %609 = vmatpush.bf16.msrb.mxu3 %v2213_v7  ;;  %v147_v38 = vadd.f32 %v2123_v23, %v146_v36 }
 0x303   :  { %v462_v0 = vpop.f32.mrf.mxu2 }
 0x304   :  { %610 = vmatpush.bf16.msrb.mxu3 %v2225_v8 }
 0x307   :  { %v148_v37 = vpop.f32.mrf.mxu0 }
 0x308   :  { %675 = vmatpush.bf16.msra.mxu3 %v2162_v63  ;;  %v149_v51 = vadd.f32 %v2123_v23, %v148_v37  ;;  %v463_v23 = vadd.f32 %v2259_v28, %v462_v0 }
 0x30c   :  { %676 = vmatpush.bf16.msra.mxu3 %v2171_v2 }
 0x310   :  { %677 = vmatpush.bf16.msra.mxu3 %v2180_v3 }
 0x314   :  { %678 = vmatpush.bf16.msra.mxu3 %v2189_v4 }
 0x318   :  { %679 = vmatpush.bf16.msra.mxu3 %v2198_v5 }
 0x31c   :  { %680 = vmatpush.bf16.msra.mxu3 %v2207_v6 }
 0x320   :  { %681 = vmatpush.bf16.msra.mxu3 %v2213_v7 }
 0x324   :  { %682 = vmatpush.bf16.msra.mxu3 %v2225_v8 }
 0x36a   :  { %v323_v21 = vpop.f32.mrf.mxu3 }
 0x36b   :  { %v327_v22 = vadd.f32 %v323_v21, %v144_v20 }
 0x36d   :  { %1881 = vtanh.f32 %v327_v22 }
 0x372   :  { %v325_v24 = vpop.f32.mrf.mxu3 }
 0x373   :  { %v1882_v25 = vpop.eup %1881 }
 0x374   :  { %v331_v26 = vpack.c.bf16 %v1882_v25, %v1882_v25  ;;  %v376_v27 = vpack.c.bf16 %v1882_v25, %v1880_v14 }
 0x376   :  { %340 = vmatmul.bf16.vlgmr.msrb.gmra.mxu0 %v331_v26  ;;  %464 = vmatmul.bf16.gmra.mxu2 %v376_v27 }
 0x377   :  { %621 = vmatpush.bf16.msrb.mxu0 %v2162_v63 }
 0x37a   :  { %v558_v31 = vpop.f32.mrf.mxu3 }
 0x37b   :  { %v562_v32 = vadd.f32 %v558_v31, %v456_v30  ;;  %622 = vmatpush.bf16.msrb.mxu0 %v2171_v2 }
 0x37d   :  { %1883 = vtanh.f32 %v562_v32 }
 0x37f   :  { %623 = vmatpush.bf16.msrb.mxu0 %v2180_v3 }
 0x382   :  { %v560_v33 = vpop.f32.mrf.mxu3 }
 0x383   :  { %v1884_v34 = vpop.eup %1883  ;;  %624 = vmatpush.bf16.msrb.mxu0 %v2189_v4 }
 0x384   :  { %564 = vst [vmem:[#allocation2] sm:$0xff] %v1884_v34  ;;  %v566_v35 = vpack.c.bf16 %v1884_v34, %v1884_v34 }
 0x386   :  { %575 = vmatmul.bf16.vlgmr.msra.gmra.mxu0 %v566_v35 }
 0x387   :  { %625 = vmatpush.bf16.msrb.mxu0 %v2198_v5 }
 0x38b   :  { %626 = vmatpush.bf16.msrb.mxu0 %v2207_v6 }
 0x38f   :  { %627 = vmatpush.bf16.msrb.mxu0 %v2213_v7 }
 0x393   :  { %628 = vmatpush.bf16.msrb.mxu0 %v2225_v8 }
 0x3f3   :  { %v341_v39 = vpop.f32.mrf.mxu0 }
 0x3f4   :  { %v345_v40 = vadd.f32 %v341_v39, %v147_v38 }
 0x3f6   :  { %1885 = vtanh.f32 %v345_v40 }
 0x3fb   :  { %v343_v41 = vpop.f32.mrf.mxu0 }
 0x3fc   :  { %v1886_v42 = vpop.eup %1885 }
 0x3fd   :  { %v349_v43 = vpack.c.bf16 %v1886_v42, %v1886_v42 }
 0x3ff   :  { %358 = vmatmul.bf16.vlgmr.msra.gmra.mxu1 %v349_v43 }
 0x400   :  { %639 = vmatpush.bf16.msra.mxu1 %v2162_v63 }
 0x403   :  { %v576_v46 = vpop.f32.mrf.mxu0 }
 0x404   :  { %v580_v47 = vadd.f32 %v576_v46, %v458_v45  ;;  %640 = vmatpush.bf16.msra.mxu1 %v2171_v2  ;;  %v2304_v45 = vld [vmem:[%s2688_s8 + $0x30] sm:$0xff] }
 0x406   :  { %1887 = vtanh.f32 %v580_v47 }
 0x408   :  { %641 = vmatpush.bf16.msra.mxu1 %v2180_v3 }
 0x40b   :  { %v578_v48 = vpop.f32.mrf.mxu0 }
 0x40c   :  { %v1888_v49 = vpop.eup %1887  ;;  %642 = vmatpush.bf16.msra.mxu1 %v2189_v4 }
 0x40d   :  { %582 = vst [vmem:[#allocation2 + $0x8] sm:$0xff] %v1888_v49  ;;  %v584_v50 = vpack.c.bf16 %v1888_v49, %v1888_v49 }
 0x40f   :  { %593 = vmatmul.bf16.vlgmr.msrb.gmra.mxu1 %v584_v50  ;;  %v2311_v50 = vld [vmem:[%s2688_s8 + $0x28] sm:$0xff] }
 0x410   :  { %643 = vmatpush.bf16.msra.mxu1 %v2198_v5 }
 0x414   :  { %644 = vmatpush.bf16.msra.mxu1 %v2207_v6  ;;  %v465_v6 = vpop.f32.mrf.mxu2 }
 0x418   :  { %645 = vmatpush.bf16.msra.mxu1 %v2213_v7  ;;  %v466_v7 = vadd.f32 %v2259_v28, %v465_v6 }
 0x41c   :  { %646 = vmatpush.bf16.msra.mxu1 %v2225_v8  ;;  %v467_v13 = vpop.f32.mrf.mxu2 }
 0x41d   :  { %v468_v14 = vadd.f32 %v2259_v28, %v467_v13 }
 0x47c   :  { %v359_v52 = vpop.f32.mrf.mxu1 }
 0x47d   :  { %v363_v53 = vadd.f32 %v359_v52, %v149_v51  ;;  %v2318_v51 = vld [vmem:[%s2688_s8 + $0x20] sm:$0xff]  ;;  %v2325_v52 = vld [vmem:[%s2688_s8 + $0x18] sm:$0xff] }
 0x47f   :  { %1889 = vtanh.f32 %v363_v53  ;;  %v2332_v53 = vld [vmem:[%s2688_s8 + $0x10] sm:$0xff] }
 0x484   :  { %v361_v54 = vpop.f32.mrf.mxu1 }
 0x485   :  { %v1890_v55 = vpop.eup %1889  ;;  %v2339_v54 = vld [vmem:[%s2688_s8 + $0x8] sm:$0xff] }
 0x486   :  { %v377_v56 = vpack.c.bf16 %v1890_v55, %v1886_v42 }
 0x488   :  { %469 = vmatmul.bf16.gmra.mxu2 %v377_v56 }
 0x48c   :  { %v594_v59 = vpop.f32.mrf.mxu1 }
 0x48d   :  { %v598_v60 = vadd.f32 %v594_v59, %v461_v58 }
 0x48f   :  { %1891 = vtanh.f32 %v598_v60  ;;  %v2346_v60 = vld [vmem:[%s2688_s8] sm:$0xff] }
 0x494   :  { %v596_v61 = vpop.f32.mrf.mxu1 }
 0x495   :  { %v1892_v62 = vpop.eup %1891 }
 0x496   :  { %600 = vst [vmem:[#allocation2 + $0x10] sm:$0xff] %v1892_v62  ;;  %v602_v63 = vpack.c.bf16 %v1892_v62, %v1892_v62 }
 0x498   :  { %611 = vmatmul.bf16.vlgmr.msrb.gmra.mxu3 %v602_v63 }
 0x50b   :  { %v470_v20 = vpop.f32.mrf.mxu2 }
 0x50c   :  { %v471_v22 = vadd.f32 %v2259_v28, %v470_v20 }
 0x513   :  { %v472_v21 = vpop.f32.mrf.mxu2 }
 0x514   :  { %v473_v30 = vadd.f32 %v2259_v28, %v472_v21  ;;  %v2296_v28 = vld [vmem:[%s2688_s8 + $0x38] sm:$0xff]  ;;  %s1796_s8 = sshll.u32 %s2354_s27, 3 }
 0x515   :  { %s1564_s1 = scalar_lea.vmem [#allocation2], %s1796_s8 }
 0x51b   :  { %v612_v1 = vpop.f32.mrf.mxu3 }
 0x51c   :  { %v616_v2 = vadd.f32 %v612_v1, %v463_v23 }
 0x51e   :  { %1893 = vtanh.f32 %v616_v2 }
 0x523   :  { %v614_v3 = vpop.f32.mrf.mxu3 }
 0x524   :  { %v1894_v4 = vpop.eup %1893 }
 0x525   :  { %618 = vst [vmem:[#allocation2 + $0x18] sm:$0xff] %v1894_v4  ;;  %v620_v5 = vpack.c.bf16 %v1894_v4, %v1894_v4 }
 0x527   :  { %629 = vmatmul.bf16.vlgmr.msrb.gmra.mxu0 %v620_v5 }
 0x52c   :  { %v728_v35 = vld [vmem:[#allocation2] ss:$8 sm:$0xf]  ;;  %v913_v36 = vld [vmem:[#allocation2 + $0x1] ss:$8 sm:$0xf] }
 0x52d   :  { %v1000_v57 = vld [vmem:[#allocation2 + $0x2] ss:$8 sm:$0xf]  ;;  %v1087_v59 = vld [vmem:[#allocation2 + $0x3] ss:$8 sm:$0xf] }
 0x52e   :  { %v1174_v5 = vld [vmem:[#allocation2 + $0x4] ss:$8 sm:$0xf] }
 0x5a4   :  { %v630_v8 = vpop.f32.mrf.mxu0 }
 0x5a5   :  { %v634_v9 = vadd.f32 %v630_v8, %v466_v7  ;;  %v1261_v7 = vld [vmem:[#allocation2 + $0x5] ss:$8 sm:$0xf] }
 0x5a7   :  { %1895 = vtanh.f32 %v634_v9 }
 0x5ac   :  { %v632_v10 = vpop.f32.mrf.mxu0 }
 0x5ad   :  { %v1896_v11 = vpop.eup %1895 }
 0x5ae   :  { %636 = vst [vmem:[#allocation2 + $0x20] sm:$0xff] %v1896_v11  ;;  %v638_v12 = vpack.c.bf16 %v1896_v11, %v1896_v11 }
 0x5b0   :  { %647 = vmatmul.bf16.vlgmr.msra.gmra.mxu1 %v638_v12 }
 0x62d   :  { %v648_v15 = vpop.f32.mrf.mxu1 }
 0x62e   :  { %v652_v16 = vadd.f32 %v648_v15, %v468_v14 }
 0x630   :  { %1897 = vtanh.f32 %v652_v16 }
 0x635   :  { %v650_v17 = vpop.f32.mrf.mxu1 }
 0x636   :  { %v1898_v18 = vpop.eup %1897  ;;  %v1348_v17 = vld [vmem:[#allocation2 + $0x6] ss:$8 sm:$0xf] }
 0x637   :  { %654 = vst [vmem:[#allocation2 + $0x28] sm:$0xff] %v1898_v18  ;;  %v656_v19 = vpack.c.bf16 %v1898_v18, %v1898_v18 }
 0x639   :  { %665 = vmatmul.bf16.vlgmr.msrb.gmra.mxu2 %v656_v19  ;;  %v1435_v19 = vld [vmem:[#allocation2 + $0x7] ss:$8 sm:$0xf] }
 0x6bc   :  { %v666_v24 = vpop.f32.mrf.mxu2 }
 0x6bd   :  { %v670_v25 = vadd.f32 %v666_v24, %v471_v22 }
 0x6bf   :  { %1899 = vtanh.f32 %v670_v25 }
 0x6c4   :  { %v668_v26 = vpop.f32.mrf.mxu2 }
 0x6c5   :  { %v1900_v27 = vpop.eup %1899 }
 0x6c6   :  { %672 = vst [vmem:[#allocation2 + $0x30] sm:$0xff] %v1900_v27  ;;  %v674_v29 = vpack.c.bf16 %v1900_v27, %v1900_v27 }
 0x6c8   :  { %683 = vmatmul.bf16.vlgmr.msra.gmra.mxu3 %v674_v29  ;;  %v724_v29 = vlaneseq }
 0x74b   :  { %v684_v31 = vpop.f32.mrf.mxu3 }
 0x74c   :  { %v688_v32 = vadd.f32 %v684_v31, %v473_v30  ;;  %v749_v31 = vstv %s2287_s5 }
 0x74e   :  { %1901 = vtanh.f32 %v688_v32  ;;  %v2436_v32 = vand.u32 127, %v724_v29 }
 0x750   :  { %vm750_vm1 = vcmp.lt.s32.totalorder %v2436_v32, %v749_v31 }
 0x753   :  { %v686_v33 = vpop.f32.mrf.mxu3 }
 0x754   :  { %v1902_v34 = vpop.eup %1901 }
 0x755   :  { %690 = vst [vmem:[#allocation2 + $0x38] sm:$0xff] %v1902_v34  ;;  %v935_v34 = vstv %s2289_s30 }
 0x756   :  { %vm936_vm3 = vcmp.lt.s32.totalorder %v2436_v32, %v935_v34 }
 0x75c   :  { %v729_v37 = vld [vmem:[#allocation2] ss:$8 sm:$0xf0]  ;;  %v914_v38 = vld [vmem:[#allocation2 + $0x1] ss:$8 sm:$0xf0] }
 0x75d   :  { %v730_v39 = vor.u32 %v729_v37, %v728_v35  ;;  %v915_v40 = vor.u32 %v914_v38, %v913_v36  ;;  %v733_v46 = vld [vmem:[%s732_s15] sm:$0x1]  ;;  %v1793_v47 = vld [vmem:[%s1561_s3 + $0x1] sm:$0x1]  ;;  %v1797_v0 = vld [vmem:[%s1564_s1 + $0x2] sm:$0x1] }
 0x75e   :  { %v735_v48 = vpack.c.bf16 %v733_v46, %v733_v46  ;;  %v921_v49 = vpack.c.bf16 %v1793_v47, %v1793_v47  ;;  %v1001_v55 = vld [vmem:[#allocation2 + $0x2] ss:$8 sm:$0xf0]  ;;  %v1088_v56 = vld [vmem:[#allocation2 + $0x3] ss:$8 sm:$0xf0]  ;;  %v1008_v1 = vpack.c.bf16 %v1797_v0, %v1797_v0  ;;  %v1109_v47 = vstv %s2358_s6 }
 0x75f   :  { %v734_v41 = vpack.c.bf16 %v730_v39, %v730_v39  ;;  %v920_v42 = vpack.c.bf16 %v915_v40, %v915_v40  ;;  %v1002_v58 = vor.u32 %v1001_v55, %v1000_v57  ;;  %v1089_v61 = vor.u32 %v1088_v56, %v1087_v59  ;;  %v1801_v23 = vld [vmem:[%s1567_s29 + $0x3] sm:$0x1]  ;;  %v1175_v3 = vld [vmem:[#allocation2 + $0x4] ss:$8 sm:$0xf0]  ;;  %s2410_s15 = sld [smem:[#allocation4 + $0x6]] }
 0x760   :  { %v1095_v2 = vpack.c.bf16 %v1801_v23, %v1801_v23  ;;  %v1262_v4 = vld [vmem:[#allocation2 + $0x5] ss:$8 sm:$0xf0]  ;;  %v1176_v6 = vor.u32 %v1175_v3, %v1174_v5  ;;  %v1805_v11 = vld [vmem:[%s1570_s14 + $0x4] sm:$0x1]  ;;  %s2414_s3 = sld [smem:[#allocation4 + $0x7]]  ;;  %vm1110_vm5 = vcmp.lt.s32.totalorder %v2436_v32, %v1109_v47  ;;  %v1196_v59 = vstv %s2382_s2 }
 0x761   :  { %743 = vmatpush.bf16.xpose.msra.mxu2 %v734_v41  ;;  %929 = vmatpush.bf16.xpose.msra.mxu0 %v920_v42  ;;  %v771_v43 = vsel %vm769_vm0, %v734_v41, 0  ;;  %v954_v44 = vsel %vm769_vm0, %v920_v42, 0  ;;  %v2349_v62 = vpack.c.bf16 %v1002_v58, %v1002_v58  ;;  %v2352_v63 = vpack.c.bf16 %v1089_v61, %v1089_v61  ;;  %v1809_v12 = vld [vmem:[%s1573_s4 + $0x5] sm:$0x1]  ;;  %v2506_v47 = vld [vmem:[%s2687_s7 + $0x30] sm:$0xff] }
 0x762   :  { %780 = vmatpush.bf16.msrb.mxu3 %v771_v43  ;;  %963 = vmatpush.bf16.msrb.mxu1 %v954_v44  ;;  %v1263_v8 = vor.u32 %v1262_v4, %v1261_v7  ;;  %v2377_v9 = vpack.c.bf16 %v1176_v6, %v1176_v6  ;;  %v1182_v13 = vpack.c.bf16 %v1805_v11, %v1805_v11  ;;  %v1349_v15 = vld [vmem:[#allocation2 + $0x6] ss:$8 sm:$0xf0]  ;;  %v1436_v16 = vld [vmem:[#allocation2 + $0x7] ss:$8 sm:$0xf0] }
 0x763   :  { %v1269_v14 = vpack.c.bf16 %v1809_v12, %v1809_v12  ;;  %v1350_v18 = vor.u32 %v1349_v15, %v1348_v17  ;;  %v1437_v20 = vor.u32 %v1436_v16, %v1435_v19  ;;  %vm1197_vm6 = vcmp.lt.s32.totalorder %v2436_v32, %v1196_v59 }
 0x764   :  { %v2380_v10 = vpack.c.bf16 %v1263_v8, %v1263_v8 }
 0x765   :  { %v2405_v21 = vpack.c.bf16 %v1350_v18, %v1350_v18  ;;  %v2408_v22 = vpack.c.bf16 %v1437_v20, %v1437_v20  ;;  %s1812_s16 = sshll.u32 %s2410_s15, 3 }
 0x766   :  { %s1816_s17 = sshll.u32 %s2414_s3, 3  ;;  %s1576_s18 = scalar_lea.vmem [#allocation2], %s1812_s16  ;;  %v1457_v59 = vstv %s2414_s3 }
 0x767   :  { %v1813_v24 = vld [vmem:[%s1576_s18 + $0x6] sm:$0x1]  ;;  %s1579_s19 = scalar_lea.vmem [#allocation2], %s1816_s17  ;;  %vm1458_vm9 = vcmp.lt.s32.totalorder %v2436_v32, %v1457_v59 }
 0x768   :  { %744 = vmatmul.bf16.vlgmr.msra.gmra.mxu2 %v735_v48  ;;  %930 = vmatmul.bf16.vlgmr.msra.gmra.mxu0 %v921_v49  ;;  %v1817_v25 = vld [vmem:[%s1579_s19 + $0x7] sm:$0x1]  ;;  %v1356_v26 = vpack.c.bf16 %v1813_v24, %v1813_v24 }
 0x769   :  { %835 = vmatpush.bf16.msrb.mxu2 %v2296_v28  ;;  %970 = vmatpush.bf16.msrb.mxu0 %v2296_v28  ;;  %v1443_v27 = vpack.c.bf16 %v1817_v25, %v1817_v25 }
 0x76d   :  { %836 = vmatpush.bf16.msrb.mxu2 %v2304_v45  ;;  %971 = vmatpush.bf16.msrb.mxu0 %v2304_v45 }
 0x771   :  { %837 = vmatpush.bf16.msrb.mxu2 %v2311_v50  ;;  %972 = vmatpush.bf16.msrb.mxu0 %v2311_v50 }
 0x775   :  { %838 = vmatpush.bf16.msrb.mxu2 %v2318_v51  ;;  %973 = vmatpush.bf16.msrb.mxu0 %v2318_v51 }
 0x779   :  { %839 = vmatpush.bf16.msrb.mxu2 %v2325_v52  ;;  %974 = vmatpush.bf16.msrb.mxu0 %v2325_v52 }
 0x77d   :  { %840 = vmatpush.bf16.msrb.mxu2 %v2332_v53  ;;  %975 = vmatpush.bf16.msrb.mxu0 %v2332_v53 }
 0x781   :  { %841 = vmatpush.bf16.msrb.mxu2 %v2339_v54  ;;  %976 = vmatpush.bf16.msrb.mxu0 %v2339_v54 }
 0x785   :  { %842 = vmatpush.bf16.msrb.mxu2 %v2346_v60  ;;  %977 = vmatpush.bf16.msrb.mxu0 %v2346_v60 }
 0x788   :  { %843 = vmatmul.bf16.vlgmr.msrb.gmra.mxu2 %v735_v48  ;;  %978 = vmatmul.bf16.vlgmr.msrb.gmra.mxu0 %v921_v49 }
 0x789   :  { %1016 = vmatpush.bf16.xpose.msra.mxu2 %v2349_v62  ;;  %1103 = vmatpush.bf16.xpose.msra.mxu0 %v2352_v63 }
 0x791   :  { %1057 = vmatpush.bf16.msrb.mxu2 %v2296_v28  ;;  %1144 = vmatpush.bf16.msrb.mxu0 %v2296_v28 }
 0x795   :  { %1058 = vmatpush.bf16.msrb.mxu2 %v2304_v45  ;;  %1145 = vmatpush.bf16.msrb.mxu0 %v2304_v45 }
 0x798   :  { %1017 = vmatmul.bf16.vlgmr.msra.gmra.mxu2 %v1008_v1  ;;  %1104 = vmatmul.bf16.vlgmr.msra.gmra.mxu0 %v1095_v2 }
 0x799   :  { %1059 = vmatpush.bf16.msrb.mxu2 %v2311_v50  ;;  %1146 = vmatpush.bf16.msrb.mxu0 %v2311_v50 }
 0x79d   :  { %1060 = vmatpush.bf16.msrb.mxu2 %v2318_v51  ;;  %1147 = vmatpush.bf16.msrb.mxu0 %v2318_v51 }
 0x7a1   :  { %1061 = vmatpush.bf16.msrb.mxu2 %v2325_v52  ;;  %1148 = vmatpush.bf16.msrb.mxu0 %v2325_v52 }
 0x7a5   :  { %1062 = vmatpush.bf16.msrb.mxu2 %v2332_v53  ;;  %1149 = vmatpush.bf16.msrb.mxu0 %v2332_v53 }
 0x7a9   :  { %1063 = vmatpush.bf16.msrb.mxu2 %v2339_v54  ;;  %1150 = vmatpush.bf16.msrb.mxu0 %v2339_v54 }
 0x7ad   :  { %1064 = vmatpush.bf16.msrb.mxu2 %v2346_v60  ;;  %1151 = vmatpush.bf16.msrb.mxu0 %v2346_v60 }
 0x7b0   :  { %1065 = vmatmul.bf16.vlgmr.msrb.gmra.mxu2 %v1008_v1  ;;  %1152 = vmatmul.bf16.vlgmr.msrb.gmra.mxu0 %v1095_v2 }
 0x7b1   :  { %1190 = vmatpush.bf16.xpose.msra.mxu2 %v2377_v9  ;;  %1277 = vmatpush.bf16.xpose.msra.mxu0 %v2380_v10 }
 0x7b9   :  { %1231 = vmatpush.bf16.msrb.mxu2 %v2296_v28  ;;  %1318 = vmatpush.bf16.msrb.mxu0 %v2296_v28 }
 0x7bd   :  { %1232 = vmatpush.bf16.msrb.mxu2 %v2304_v45  ;;  %1319 = vmatpush.bf16.msrb.mxu0 %v2304_v45 }
 0x7c0   :  { %1191 = vmatmul.bf16.vlgmr.msra.gmra.mxu2 %v1182_v13  ;;  %1278 = vmatmul.bf16.vlgmr.msra.gmra.mxu0 %v1269_v14 }
 0x7c1   :  { %1233 = vmatpush.bf16.msrb.mxu2 %v2311_v50  ;;  %1320 = vmatpush.bf16.msrb.mxu0 %v2311_v50 }
 0x7c5   :  { %1234 = vmatpush.bf16.msrb.mxu2 %v2318_v51  ;;  %1321 = vmatpush.bf16.msrb.mxu0 %v2318_v51 }
 0x7c9   :  { %1235 = vmatpush.bf16.msrb.mxu2 %v2325_v52  ;;  %1322 = vmatpush.bf16.msrb.mxu0 %v2325_v52 }
 0x7cd   :  { %1236 = vmatpush.bf16.msrb.mxu2 %v2332_v53  ;;  %1323 = vmatpush.bf16.msrb.mxu0 %v2332_v53 }
 0x7d1   :  { %1237 = vmatpush.bf16.msrb.mxu2 %v2339_v54  ;;  %1324 = vmatpush.bf16.msrb.mxu0 %v2339_v54 }
 0x7d5   :  { %1238 = vmatpush.bf16.msrb.mxu2 %v2346_v60  ;;  %1325 = vmatpush.bf16.msrb.mxu0 %v2346_v60 }
 0x7d8   :  { %1239 = vmatmul.bf16.vlgmr.msrb.gmra.mxu2 %v1182_v13  ;;  %1326 = vmatmul.bf16.vlgmr.msrb.gmra.mxu0 %v1269_v14 }
 0x7d9   :  { %1364 = vmatpush.bf16.xpose.msra.mxu2 %v2405_v21  ;;  %1451 = vmatpush.bf16.xpose.msra.mxu0 %v2408_v22 }
 0x7e1   :  { %1405 = vmatpush.bf16.msrb.mxu2 %v2296_v28  ;;  %1492 = vmatpush.bf16.msrb.mxu0 %v2296_v28 }
 0x7e5   :  { %1406 = vmatpush.bf16.msrb.mxu2 %v2304_v45  ;;  %1493 = vmatpush.bf16.msrb.mxu0 %v2304_v45  ;;  %v931_v30 = vpop.f32.mrf.mxu0  ;;  %v1022_v45 = vstv %s2354_s27 }
 0x7e6   :  { %v937_v38 = vsel %vm936_vm3, %v931_v30, -1e+09  ;;  %vm1023_vm4 = vcmp.lt.s32.totalorder %v2436_v32, %v1022_v45 }
 0x7e7   :  { %v938_v40 = vsel %vm752_vm2, %v937_v38, -inf }
 0x7e8   :  { %1365 = vmatmul.bf16.vlgmr.msra.gmra.mxu2 %v1356_v26  ;;  %1452 = vmatmul.bf16.vlgmr.msra.gmra.mxu0 %v1443_v27 }
 0x7e9   :  { %1407 = vmatpush.bf16.msrb.mxu2 %v2311_v50  ;;  %1494 = vmatpush.bf16.msrb.mxu0 %v2311_v50 }
 0x7eb   :  { %v745_v33 = vpop.f32.mrf.mxu2 }
 0x7ec   :  { %v751_v35 = vsel %vm750_vm1, %v745_v33, -1e+09 }
 0x7ed   :  { %1408 = vmatpush.bf16.msrb.mxu2 %v2318_v51  ;;  %1495 = vmatpush.bf16.msrb.mxu0 %v2318_v51  ;;  %v933_v36 = vpop.f32.mrf.mxu0  ;;  %v753_v37 = vsel %vm752_vm2, %v751_v35, -inf }
 0x7ee   :  { %754 = vmax.xlane.f32.xlu0 %v753_v37  ;;  %v1283_v37 = vstv %s2386_s11 }
 0x7ef   :  { %vm1284_vm7 = vcmp.lt.s32.totalorder %v2436_v32, %v1283_v37 }
 0x7f1   :  { %1409 = vmatpush.bf16.msrb.mxu2 %v2325_v52  ;;  %1496 = vmatpush.bf16.msrb.mxu0 %v2325_v52 }
 0x7f3   :  { %v747_v39 = vpop.f32.mrf.mxu2 }
 0x7f5   :  { %1410 = vmatpush.bf16.msrb.mxu2 %v2332_v53  ;;  %1497 = vmatpush.bf16.msrb.mxu0 %v2332_v53 }
 0x7f6   :  { %939 = vmax.xlane.f32.xlu0 %v938_v40 }
 0x7f9   :  { %1411 = vmatpush.bf16.msrb.mxu2 %v2339_v54  ;;  %1498 = vmatpush.bf16.msrb.mxu0 %v2339_v54 }
 0x7fd   :  { %1412 = vmatpush.bf16.msrb.mxu2 %v2346_v60  ;;  %1499 = vmatpush.bf16.msrb.mxu0 %v2346_v60 }
 0x800   :  { %1413 = vmatmul.bf16.vlgmr.msrb.gmra.mxu2 %v1356_v26  ;;  %1500 = vmatmul.bf16.vlgmr.msrb.gmra.mxu0 %v1443_v27 }
 0x805   :  { %v2443_v28 = vpop.f32.mrf.mxu0 }
 0x80b   :  { %v2445_v41 = vpop.f32.mrf.mxu2 }
 0x80d   :  { %v981_v42 = vpop.f32.mrf.mxu0 }
 0x813   :  { %v846_v43 = vpop.f32.mrf.mxu2 }
 0x814   :  { %v1370_v43 = vstv %s2410_s15 }
 0x815   :  { %v1105_v44 = vpop.f32.mrf.mxu0  ;;  %vm1371_vm8 = vcmp.lt.s32.totalorder %v2436_v32, %v1370_v43  ;;  %v2559_v32 = vld [vmem:[%s2687_s7] sm:$0xff] }
 0x816   :  { %v1111_v51 = vsel %vm1110_vm5, %v1105_v44, -1e+09 }
 0x817   :  { %v1112_v53 = vsel %vm752_vm2, %v1111_v51, -inf }
 0x81b   :  { %v1018_v46 = vpop.f32.mrf.mxu2 }
 0x81c   :  { %v1024_v48 = vsel %vm1023_vm4, %v1018_v46, -1e+09  ;;  %v2499_v46 = vld [vmem:[%s2687_s7 + $0x38] sm:$0xff] }
 0x81d   :  { %v1025_v49 = vsel %vm752_vm2, %v1024_v48, -inf  ;;  %v1107_v50 = vpop.f32.mrf.mxu0  ;;  %896 = vmatpush.bf16.msra.mxu3 %v2499_v46  ;;  %983 = vmatpush.bf16.msra.mxu1 %v2499_v46 }
 0x81e   :  { %1026 = vmax.xlane.f32.xlu2 %v1025_v49  ;;  %v2513_v49 = vld [vmem:[%s2687_s7 + $0x28] sm:$0xff] }
 0x821   :  { %897 = vmatpush.bf16.msra.mxu3 %v2506_v47  ;;  %984 = vmatpush.bf16.msra.mxu1 %v2506_v47 }
 0x823   :  { %v1020_v52 = vpop.f32.mrf.mxu2 }
 0x825   :  { %898 = vmatpush.bf16.msra.mxu3 %v2513_v49  ;;  %985 = vmatpush.bf16.msra.mxu1 %v2513_v49 }
 0x826   :  { %1113 = vmax.xlane.f32.xlu2 %v1112_v53 }
 0x82d   :  { %v2453_v54 = vpop.f32.mrf.mxu0 }
 0x833   :  { %v2455_v55 = vpop.f32.mrf.mxu2 }
 0x835   :  { %v1155_v56 = vpop.f32.mrf.mxu0 }
 0x83b   :  { %v1068_v57 = vpop.f32.mrf.mxu2 }
 0x83c   :  { %v2529_v57 = vld [vmem:[%s2687_s7 + $0x18] sm:$0xff] }
 0x83d   :  { %v1279_v58 = vpop.f32.mrf.mxu0 }
 0x83e   :  { %v2487_v40 = vsel %vm1284_vm7, %v1279_v58, -1e+09 }
 0x83f   :  { %v1286_v44 = vsel %vm752_vm2, %v2487_v40, -inf }
 0x843   :  { %v1192_v60 = vpop.f32.mrf.mxu2 }
 0x844   :  { %v2459_v61 = vsel %vm1197_vm6, %v1192_v60, -1e+09 }
 0x845   :  { %v1199_v0 = vsel %vm752_vm2, %v2459_v61, -inf  ;;  %v1281_v23 = vpop.f32.mrf.mxu0 }
 0x846   :  { %1200 = vmax.xlane.f32.xlu2 %v1199_v0  ;;  %v2545_v23 = vld [vmem:[%s2687_s7 + $0x10] sm:$0xff] }
 0x84b   :  { %v1194_v1 = vpop.f32.mrf.mxu2 }
 0x84c   :  { %v2551_v1 = vld [vmem:[%s2687_s7 + $0x8] sm:$0xff] }
 0x855   :  { %v2463_v2 = vpop.f32.mrf.mxu0 }
 0x85b   :  { %v2465_v3 = vpop.f32.mrf.mxu2 }
 0x85d   :  { %v1329_v4 = vpop.f32.mrf.mxu0 }
 0x861   :  { %v755_v13 = vpop.xlane.xlu0 %754 }
 0x862   :  { %v756_v14 = vsub.f32 %v751_v35, %v755_v13 }
 0x863   :  { %v1242_v5 = vpop.f32.mrf.mxu2 }
 0x864   :  { %v757_v15 = vmul.f32 1.442695, %v756_v14 }
 0x865   :  { %v2467_v6 = vpop.f32.mrf.mxu0 }
 0x866   :  { %1903 = vpow2.f32 %v757_v15 }
 0x869   :  { %v940_v18 = vpop.xlane.xlu0 %939 }
 0x86a   :  { %v941_v19 = vsub.f32 %v937_v38, %v940_v18 }
 0x86b   :  { %v1366_v7 = vpop.f32.mrf.mxu2 }
 0x86c   :  { %v2473_v20 = vpop.eup %1903  ;;  %v942_v24 = vmul.f32 1.442695, %v941_v19 }
 0x86d   :  { %v1455_v8 = vpop.f32.mrf.mxu0  ;;  %v759_v26 = vsel %vm752_vm2, %v2473_v20, 0.0 }
 0x86e   :  { %1905 = vpow2.f32 %v942_v24  ;;  %760 = vadd.xlane.f32.xlu1 %v759_v26 }
 0x873   :  { %v1368_v11 = vpop.f32.mrf.mxu2 }
 0x874   :  { %v2477_v27 = vpop.eup %1905  ;;  %v1041_v11 = vsel %vm769_vm0, %v2349_v62, 0 }
 0x875   :  { %v944_v29 = vsel %vm752_vm2, %v2477_v27, 0.0 }
 0x876   :  { %945 = vadd.xlane.f32.xlu1 %v944_v29 }
 0x87d   :  { %v2469_v12 = vpop.f32.mrf.mxu0 }
 0x883   :  { %v2471_v16 = vpop.f32.mrf.mxu2 }
 0x885   :  { %v1503_v17 = vpop.f32.mrf.mxu0 }
 0x886   :  { %v1128_v17 = vsel %vm769_vm0, %v2352_v63, 0 }
 0x88b   :  { %v1416_v25 = vpop.f32.mrf.mxu2 }
 0x891   :  { %v1027_v30 = vpop.xlane.xlu2 %1026 }
 0x892   :  { %v1028_v31 = vsub.f32 %v1024_v48, %v1027_v30  ;;  %v1372_v48 = vsel %vm1371_vm8, %v1366_v7, -1e+09 }
 0x893   :  { %v1373_v50 = vsel %vm752_vm2, %v1372_v48, -inf }
 0x894   :  { %v1029_v33 = vmul.f32 1.442695, %v1028_v31 }
 0x896   :  { %1907 = vpow2.f32 %v1029_v33 }
 0x899   :  { %v1114_v34 = vpop.xlane.xlu2 %1113 }
 0x89a   :  { %v1115_v35 = vsub.f32 %v1111_v51, %v1114_v34  ;;  %v2521_v51 = vld [vmem:[%s2687_s7 + $0x20] sm:$0xff] }
 0x89b   :  { %899 = vmatpush.bf16.msra.mxu3 %v2521_v51  ;;  %986 = vmatpush.bf16.msra.mxu1 %v2521_v51 }
 0x89c   :  { %v2481_v36 = vpop.eup %1907  ;;  %v1116_v38 = vmul.f32 1.442695, %v1115_v35 }
 0x89d   :  { %v1031_v39 = vsel %vm752_vm2, %v2481_v36, 0.0 }
 0x89e   :  { %1909 = vpow2.f32 %v1116_v38  ;;  %1032 = vadd.xlane.f32.xlu0 %v1031_v39 }
 0x89f   :  { %900 = vmatpush.bf16.msra.mxu3 %v2529_v57  ;;  %987 = vmatpush.bf16.msra.mxu1 %v2529_v57 }
 0x8a3   :  { %901 = vmatpush.bf16.msra.mxu3 %v2545_v23  ;;  %988 = vmatpush.bf16.msra.mxu1 %v2545_v23 }
 0x8a4   :  { %v2489_v42 = vpop.eup %1909 }
 0x8a5   :  { %v1118_v45 = vsel %vm752_vm2, %v2489_v42, 0.0 }
 0x8a6   :  { %1287 = vmax.xlane.f32.xlu0 %v1286_v44  ;;  %1119 = vadd.xlane.f32.xlu1 %v1118_v45 }
 0x8a7   :  { %902 = vmatpush.bf16.msra.mxu3 %v2551_v1  ;;  %989 = vmatpush.bf16.msra.mxu1 %v2551_v1 }
 0x8ab   :  { %903 = vmatpush.bf16.msra.mxu3 %v2559_v32  ;;  %990 = vmatpush.bf16.msra.mxu1 %v2559_v32 }
 0x8ae   :  { %1374 = vmax.xlane.f32.xlu0 %v1373_v50 }
 0x8b9   :  { %v1201_v52 = vpop.xlane.xlu2 %1200 }
 0x8ba   :  { %v1202_v53 = vsub.f32 %v2459_v61, %v1201_v52  ;;  %v1459_v61 = vsel %vm1458_vm9, %v2467_v6, -1e+09 }
 0x8bb   :  { %v1460_v0 = vsel %vm752_vm2, %v1459_v61, -inf }
 0x8bc   :  { %v1203_v56 = vmul.f32 1.442695, %v1202_v53 }
 0x8be   :  { %1911 = vpow2.f32 %v1203_v56 }
 0x8c4   :  { %v2534_v58 = vpop.eup %1911 }
 0x8c5   :  { %v1205_v60 = vsel %vm752_vm2, %v2534_v58, 0.0 }
 0x8c6   :  { %1206 = vadd.xlane.f32.xlu1 %v1205_v60 }
 0x8ce   :  { %1461 = vmax.xlane.f32.xlu1 %v1460_v0  ;;  %v2613_v0 = vld [vmem:[%s2689_s9] sm:$0x1] }
 0x8e1   :  { %v761_v4 = vpop.xlane.xlu1 %760 }
 0x8e2   :  { %1913 = vrcp.f32 %v761_v4 }
 0x8e8   :  { %v1914_v5 = vpop.eup %1913 }
 0x8e9   :  { %v763_v6 = vmul.f32 %v1914_v5, %v2473_v20  ;;  %v946_v7 = vpop.xlane.xlu1 %945 }
 0x8ea   :  { %1915 = vrcp.f32 %v946_v7 }
 0x8eb   :  { %v764_v8 = vpack.c.bf16 %v763_v6, %v763_v6 }
 0x8ed   :  { %1726 = vmatmul.msk.bf16.vlgmr.msrb.gmra.mxu3 %vm765_vm10, %v764_v8 }
 0x8ee   :  { %1050 = vmatpush.bf16.msrb.mxu3 %v1041_v11 }
 0x8f0   :  { %v1916_v13 = vpop.eup %1915 }
 0x8f1   :  { %v948_v14 = vmul.f32 %v1916_v13, %v2477_v27 }
 0x8f3   :  { %v949_v15 = vpack.c.bf16 %v948_v14, %v948_v14 }
 0x8f5   :  { %1794 = vmatmul.msk.bf16.vlgmr.msrb.gmra.mxu1 %vm765_vm10, %v949_v15 }
 0x8f6   :  { %1137 = vmatpush.bf16.msrb.mxu1 %v1128_v17 }
 0x911   :  { %v1033_v18 = vpop.xlane.xlu0 %1032 }
 0x919   :  { %v1288_v19 = vpop.xlane.xlu0 %1287  ;;  %v1120_v30 = vpop.xlane.xlu1 %1119 }
 0x91a   :  { %v1289_v20 = vsub.f32 %v2487_v40, %v1288_v19 }
 0x91c   :  { %v1290_v24 = vmul.f32 1.442695, %v1289_v20 }
 0x91e   :  { %1917 = vpow2.f32 %v1290_v24 }
 0x921   :  { %v1375_v25 = vpop.xlane.xlu0 %1374 }
 0x922   :  { %v1376_v26 = vsub.f32 %v1372_v48, %v1375_v25 }
 0x924   :  { %v2572_v62 = vpop.eup %1917  ;;  %v1377_v29 = vmul.f32 1.442695, %v1376_v26 }
 0x925   :  { %v1292_v27 = vsel %vm752_vm2, %v2572_v62, 0.0 }
 0x926   :  { %1919 = vpow2.f32 %v1377_v29  ;;  %1293 = vadd.xlane.f32.xlu2 %v1292_v27 }
 0x92c   :  { %v2576_v31 = vpop.eup %1919 }
 0x92d   :  { %v1379_v63 = vsel %vm752_vm2, %v2576_v31, 0.0 }
 0x92e   :  { %1380 = vadd.xlane.f32.xlu2 %v1379_v63 }
 0x939   :  { %v2580_v33 = vpop.xlane.xlu1 %1206 }
 0x941   :  { %v1462_v34 = vpop.xlane.xlu1 %1461 }
 0x942   :  { %v1463_v35 = vsub.f32 %v1459_v61, %v1462_v34 }
 0x944   :  { %v1464_v37 = vmul.f32 1.442695, %v1463_v35 }
 0x946   :  { %1921 = vpow2.f32 %v1464_v37 }
 0x947   :  { %1923 = vrcp.f32 %v1033_v18 }
 0x948   :  { %1925 = vrcp.f32 %v1120_v30 }
 0x94c   :  { %v2582_v38 = vpop.eup %1921 }
 0x94d   :  { %v1466_v39 = vsel %vm752_vm2, %v2582_v38, 0.0  ;;  %v1924_v50 = vpop.eup %1923 }
 0x94e   :  { %1467 = vadd.xlane.f32.xlu0 %v1466_v39  ;;  %v1926_v53 = vpop.eup %1925  ;;  %v1035_v56 = vmul.f32 %v1924_v50, %v2481_v36  ;;  %v1215_v36 = vsel %vm769_vm0, %v2377_v9, 0 }
 0x94f   :  { %v1122_v59 = vmul.f32 %v1926_v53, %v2489_v42  ;;  %v1302_v42 = vsel %vm769_vm0, %v2380_v10, 0 }
 0x950   :  { %v1036_v60 = vpack.c.bf16 %v1035_v56, %v1035_v56 }
 0x951   :  { %v1123_v61 = vpack.c.bf16 %v1122_v59, %v1122_v59 }
 0x970   :  { %v782_v40 = vpop.f32.mrf.mxu3 }
 0x971   :  { %v786_v43 = vpack.c.bf16 %v782_v40, %v782_v40 }
 0x972   :  { %v965_v44 = vpop.f32.mrf.mxu1 }
 0x973   :  { %v969_v45 = vpack.c.bf16 %v965_v44, %v965_v44  ;;  %904 = vmatmul.bf16.vlgmr.msra.gmra.mxu3 %v786_v43 }
 0x974   :  { %1070 = vmatpush.bf16.msra.mxu3 %v2499_v46 }
 0x975   :  { %991 = vmatmul.bf16.vlgmr.msra.gmra.mxu1 %v969_v45 }
 0x976   :  { %1157 = vmatpush.bf16.msra.mxu1 %v2499_v46 }
 0x978   :  { %1071 = vmatpush.bf16.msra.mxu3 %v2506_v47  ;;  %v784_v48 = vpop.f32.mrf.mxu3 }
 0x97a   :  { %1158 = vmatpush.bf16.msra.mxu1 %v2506_v47  ;;  %v967_v52 = vpop.f32.mrf.mxu1 }
 0x97c   :  { %1072 = vmatpush.bf16.msra.mxu3 %v2513_v49 }
 0x97e   :  { %1159 = vmatpush.bf16.msra.mxu1 %v2513_v49 }
 0x980   :  { %1073 = vmatpush.bf16.msra.mxu3 %v2521_v51 }
 0x982   :  { %1160 = vmatpush.bf16.msra.mxu1 %v2521_v51 }
 0x983   :  { %1798 = vmatmul.msk.bf16.vlgmr.msrb.gmra.mxu3 %vm765_vm10, %v1036_v60 }
 0x984   :  { %1074 = vmatpush.bf16.msra.mxu3 %v2529_v57 }
 0x985   :  { %1802 = vmatmul.msk.bf16.vlgmr.msrb.gmra.mxu1 %vm765_vm10, %v1123_v61 }
 0x986   :  { %1161 = vmatpush.bf16.msra.mxu1 %v2529_v57 }
 0x988   :  { %1075 = vmatpush.bf16.msra.mxu3 %v2545_v23 }
 0x98a   :  { %1162 = vmatpush.bf16.msra.mxu1 %v2545_v23 }
 0x98c   :  { %1076 = vmatpush.bf16.msra.mxu3 %v2551_v1 }
 0x98e   :  { %1163 = vmatpush.bf16.msra.mxu1 %v2551_v1 }
 0x990   :  { %1077 = vmatpush.bf16.msra.mxu3 %v2559_v32 }
 0x992   :  { %1164 = vmatpush.bf16.msra.mxu1 %v2559_v32 }
 0x994   :  { %1224 = vmatpush.bf16.msrb.mxu3 %v1215_v36 }
 0x996   :  { %1311 = vmatpush.bf16.msrb.mxu1 %v1302_v42 }
 0x999   :  { %v1294_v17 = vpop.xlane.xlu2 %1293 }
 0x99a   :  { %1927 = vrcp.f32 %v1294_v17 }
 0x99b   :  { %1929 = vrcp.f32 %v2580_v33 }
 0x9a0   :  { %v1928_v20 = vpop.eup %1927 }
 0x9a1   :  { %v1296_v25 = vmul.f32 %v1928_v20, %v2572_v62  ;;  %v1930_v26 = vpop.eup %1929  ;;  %v1389_v62 = vsel %vm769_vm0, %v2405_v21, 0  ;;  %v1381_v56 = vpop.xlane.xlu2 %1380 }
 0x9a2   :  { %v1209_v29 = vmul.f32 %v1930_v26, %v2534_v58  ;;  %v1476_v58 = vsel %vm769_vm0, %v2408_v22, 0 }
 0x9a3   :  { %v1297_v27 = vpack.c.bf16 %v1296_v25, %v1296_v25 }
 0x9a4   :  { %v1210_v30 = vpack.c.bf16 %v1209_v29, %v1209_v29 }
 0x9c1   :  { %v1468_v45 = vpop.xlane.xlu0 %1467 }
 0x9c2   :  { %1931 = vrcp.f32 %v1468_v45 }
 0x9c3   :  { %1933 = vrcp.f32 %v1381_v56 }
 0x9f2   :  { %v992_v4 = vpop.f32.mrf.mxu1 }
 0x9f3   :  { %v993_v5 = vadd.f32 %v992_v4, %v2443_v28 }
 0x9f5   :  { %v996_v6 = vadd.f32 %v993_v5, %v2613_v0 }
 0x9f6   :  { %v905_v7 = vpop.f32.mrf.mxu3 }
 0x9f7   :  { %v906_v9 = vadd.f32 %v905_v7, %v2445_v41  ;;  %v1520_v8 = vrot.slane %v996_v6, 7 }
 0x9f9   :  { %v909_v11 = vadd.f32 %v906_v9, %v2613_v0 }
 0x9fa   :  { %v994_v13 = vpop.f32.mrf.mxu1 }
 0x9fb   :  { %v1541_v10 = vsel %vm1540_vm11, %v909_v11, %v1520_v8 }
 0x9fe   :  { %v907_v14 = vpop.f32.mrf.mxu3 }
 0xa02   :  { %v1139_v15 = vpop.f32.mrf.mxu1 }
 0xa03   :  { %v1143_v18 = vpack.c.bf16 %v1139_v15, %v1139_v15 }
 0xa05   :  { %1165 = vmatmul.bf16.vlgmr.msra.gmra.mxu1 %v1143_v18 }
 0xa06   :  { %1331 = vmatpush.bf16.msra.mxu1 %v2499_v46  ;;  %v1052_v28 = vpop.f32.mrf.mxu3 }
 0xa07   :  { %v1056_v19 = vpack.c.bf16 %v1052_v28, %v1052_v28 }
 0xa09   :  { %1078 = vmatmul.bf16.vlgmr.msra.gmra.mxu3 %v1056_v19 }
 0xa0a   :  { %1244 = vmatpush.bf16.msra.mxu3 %v2499_v46  ;;  %1332 = vmatpush.bf16.msra.mxu1 %v2506_v47  ;;  %v1141_v41 = vpop.f32.mrf.mxu1 }
 0xa0e   :  { %1245 = vmatpush.bf16.msra.mxu3 %v2506_v47  ;;  %1333 = vmatpush.bf16.msra.mxu1 %v2513_v49  ;;  %v1054_v24 = vpop.f32.mrf.mxu3 }
 0xa12   :  { %1246 = vmatpush.bf16.msra.mxu3 %v2513_v49  ;;  %1334 = vmatpush.bf16.msra.mxu1 %v2521_v51 }
 0xa15   :  { %1810 = vmatmul.msk.bf16.vlgmr.msrb.gmra.mxu1 %vm765_vm10, %v1297_v27 }
 0xa16   :  { %1247 = vmatpush.bf16.msra.mxu3 %v2521_v51  ;;  %1335 = vmatpush.bf16.msra.mxu1 %v2529_v57 }
 0xa19   :  { %1806 = vmatmul.msk.bf16.vlgmr.msrb.gmra.mxu3 %vm765_vm10, %v1210_v30 }
 0xa1a   :  { %1248 = vmatpush.bf16.msra.mxu3 %v2529_v57  ;;  %1336 = vmatpush.bf16.msra.mxu1 %v2545_v23 }
 0xa1e   :  { %1249 = vmatpush.bf16.msra.mxu3 %v2545_v23  ;;  %1337 = vmatpush.bf16.msra.mxu1 %v2551_v1 }
 0xa22   :  { %1250 = vmatpush.bf16.msra.mxu3 %v2551_v1  ;;  %1338 = vmatpush.bf16.msra.mxu1 %v2559_v32 }
 0xa26   :  { %1485 = vmatpush.bf16.msrb.mxu1 %v1476_v58  ;;  %1251 = vmatpush.bf16.msra.mxu3 %v2559_v32 }
 0xa2a   :  { %1398 = vmatpush.bf16.msrb.mxu3 %v1389_v62 }
 0xa82   :  { %v1166_v63 = vpop.f32.mrf.mxu1 }
 0xa83   :  { %v1167_v33 = vadd.f32 %v1166_v63, %v2453_v54 }
 0xa85   :  { %v1170_v39 = vadd.f32 %v1167_v33, %v2613_v0 }
 0xa87   :  { %v1526_v43 = vrot.slane %v1170_v39, 5 }
 0xa8a   :  { %v1168_v34 = vpop.f32.mrf.mxu1 }
 0xa8c   :  { %v1079_v35 = vpop.f32.mrf.mxu3 }
 0xa8d   :  { %v1080_v37 = vadd.f32 %v1079_v35, %v2455_v55  ;;  %v1932_v55 = vpop.eup %1931 }
 0xa8e   :  { %v1470_v60 = vmul.f32 %v1932_v55, %v2582_v38  ;;  %v1934_v42 = vpop.eup %1933 }
 0xa8f   :  { %v1083_v40 = vadd.f32 %v1080_v37, %v2613_v0  ;;  %v1383_v4 = vmul.f32 %v1934_v42, %v2576_v31 }
 0xa90   :  { %v1471_v61 = vpack.c.bf16 %v1470_v60, %v1470_v60 }
 0xa91   :  { %v1523_v22 = vrot.slane %v1083_v40, 6 }
 0xa92   :  { %v1313_v44 = vpop.f32.mrf.mxu1 }
 0xa93   :  { %v1543_v48 = vsel %vm1542_vm12, %v1541_v10, %v1523_v22  ;;  %v1317_v21 = vpack.c.bf16 %v1313_v44, %v1313_v44 }
 0xa94   :  { %v1081_v50 = vpop.f32.mrf.mxu3  ;;  %v1545_v52 = vsel %vm1544_vm13, %v1543_v48, %v1526_v43 }
 0xa95   :  { %1339 = vmatmul.bf16.vlgmr.msra.gmra.mxu1 %v1317_v21 }
 0xa96   :  { %1505 = vmatpush.bf16.msra.mxu1 %v2499_v46 }
 0xa9a   :  { %v1315_v54 = vpop.f32.mrf.mxu1  ;;  %1506 = vmatpush.bf16.msra.mxu1 %v2506_v47 }
 0xa9c   :  { %v1226_v53 = vpop.f32.mrf.mxu3 }
 0xa9d   :  { %v1230_v59 = vpack.c.bf16 %v1226_v53, %v1226_v53 }
 0xa9e   :  { %1507 = vmatpush.bf16.msra.mxu1 %v2513_v49 }
 0xa9f   :  { %1252 = vmatmul.bf16.vlgmr.msra.gmra.mxu3 %v1230_v59 }
 0xaa0   :  { %1418 = vmatpush.bf16.msra.mxu3 %v2499_v46  ;;  %v1384_v46 = vpack.c.bf16 %v1383_v4, %v1383_v4 }
 0xaa2   :  { %1508 = vmatpush.bf16.msra.mxu1 %v2521_v51 }
 0xaa4   :  { %v1228_v36 = vpop.f32.mrf.mxu3  ;;  %1419 = vmatpush.bf16.msra.mxu3 %v2506_v47 }
 0xaa5   :  { %1818 = vmatmul.msk.bf16.vlgmr.msrb.gmra.mxu1 %vm765_vm10, %v1471_v61 }
 0xaa6   :  { %1509 = vmatpush.bf16.msra.mxu1 %v2529_v57 }
 0xaa8   :  { %1420 = vmatpush.bf16.msra.mxu3 %v2513_v49 }
 0xaaa   :  { %1510 = vmatpush.bf16.msra.mxu1 %v2545_v23 }
 0xaac   :  { %1421 = vmatpush.bf16.msra.mxu3 %v2521_v51 }
 0xaae   :  { %1511 = vmatpush.bf16.msra.mxu1 %v2551_v1 }
 0xaaf   :  { %1814 = vmatmul.msk.bf16.vlgmr.msrb.gmra.mxu3 %vm765_vm10, %v1384_v46 }
 0xab0   :  { %1422 = vmatpush.bf16.msra.mxu3 %v2529_v57 }
 0xab2   :  { %1512 = vmatpush.bf16.msra.mxu1 %v2559_v32 }
 0xab4   :  { %1423 = vmatpush.bf16.msra.mxu3 %v2545_v23 }
 0xab8   :  { %1424 = vmatpush.bf16.msra.mxu3 %v2551_v1 }
 0xabc   :  { %1425 = vmatpush.bf16.msra.mxu3 %v2559_v32 }
 0xb12   :  { %v1340_v47 = vpop.f32.mrf.mxu1 }
 0xb13   :  { %v1341_v31 = vadd.f32 %v1340_v47, %v2463_v2 }
 0xb15   :  { %v1344_v7 = vadd.f32 %v1341_v31, %v2613_v0 }
 0xb17   :  { %v1532_v23 = vrot.slane %v1344_v7, 3 }
 0xb1a   :  { %v1342_v49 = vpop.f32.mrf.mxu1 }
 0xb22   :  { %v1253_v51 = vpop.f32.mrf.mxu3  ;;  %v1487_v38 = vpop.f32.mrf.mxu1 }
 0xb23   :  { %v1254_v5 = vadd.f32 %v1253_v51, %v2465_v3  ;;  %v1491_v6 = vpack.c.bf16 %v1487_v38, %v1487_v38 }
 0xb25   :  { %v1257_v57 = vadd.f32 %v1254_v5, %v2613_v0  ;;  %1513 = vmatmul.bf16.vlgmr.msra.gmra.mxu1 %v1491_v6 }
 0xb27   :  { %v1529_v9 = vrot.slane %v1257_v57, 4 }
 0xb29   :  { %v1546_v1 = vsel %vm769_vm0, %v1545_v52, %v1529_v9  ;;  %vm1551_vm0 = vcmask 1046528  }
 0xb2a   :  { %v1255_v32 = vpop.f32.mrf.mxu3  ;;  %v1489_v8 = vpop.f32.mrf.mxu1  ;;  %v1548_v11 = vsel %vm1547_vm14, %v1546_v1, %v1532_v23 }
 0xb32   :  { %v1400_v13 = vpop.f32.mrf.mxu3 }
 0xb33   :  { %v1404_v2 = vpack.c.bf16 %v1400_v13, %v1400_v13 }
 0xb35   :  { %1426 = vmatmul.bf16.vlgmr.msra.gmra.mxu3 %v1404_v2 }
 0xb3a   :  { %v1402_v10 = vpop.f32.mrf.mxu3 }
 0xba2   :  { %v1514_v14 = vpop.f32.mrf.mxu1 }
 0xba3   :  { %v1515_v15 = vadd.f32 %v1514_v14, %v2469_v12 }
 0xba5   :  { %v1518_v28 = vadd.f32 %v1515_v15, %v2613_v0 }
 0xba7   :  { %v1538_v20 = vrot.slane %v1518_v28, 1 }
 0xbaa   :  { %v1516_v3 = vpop.f32.mrf.mxu1 }
 0xbb8   :  { %v1427_v17 = vpop.f32.mrf.mxu3 }
 0xbb9   :  { %v1428_v18 = vadd.f32 %v1427_v17, %v2471_v16 }
 0xbbb   :  { %v1431_v19 = vadd.f32 %v1428_v18, %v2613_v0 }
 0xbbd   :  { %v1535_v41 = vrot.slane %v1431_v19, 2 }
 0xbbf   :  { %v1550_v24 = vsel %vm1549_vm15, %v1548_v11, %v1535_v41 }
 0xbc0   :  { %v1552_v25 = vsel %vm1551_vm0, %v1550_v24, %v1538_v20  ;;  %v1429_v26 = vpop.f32.mrf.mxu3 }
 0xbc1   :  { %1553 = vst [vmem:[%s2690_s10] sm:$0xff] %v1552_v25 }

</bundles_post_ra>
